<compile_context>
chip_gen: v7x
topology: tpu7x:2x2x1
jax: 0.10.0
libtpu: 0.0.40
codegen_flags: <defaults>
</compile_context>

<pallas_src>
import functools

import numpy as np
import jax
import jax.numpy as jnp
from jax.experimental import pallas as pl
from jax.experimental.pallas import tpu as pltpu


# ------------- fused conv3x3 + bias + PReLU (pre-shuffle) kernel -------------------
def _conv3x3_bias_prelu_kernel(x_ref, w_ref, b_ref, a_ref, o_ref, xp_ref, col_ref,
                               *, H, W, Cin, TH):
    # x_ref:   (1, H, W, Cin)        bf16  unpadded NHWC activation (one image)
    # w_ref:   (9*Cin, Cout)         bf16  rows ordered (tap-major, channel-minor)
    # b_ref:   (1, Cout)             f32   conv bias
    # a_ref:   (1, Cout)             f32   PReLU slope, pre-shuffle channel order
    # o_ref:   (1, TH*W, Cout)       bf16  output row block
    # xp_ref:  (H+2, W+2, Cin)       bf16  VMEM scratch: zero-padded activation
    # col_ref: (TH*W, 9*Cin)         bf16  VMEM scratch: im2col LHS for this row block
    rb = pl.program_id(1)

    # Fold the zero-pad into the kernel: fill the padded scratch once per image
    # (row axis is "arbitrary" => rb==0 runs first for every image on every core).
    @pl.when(rb == 0)
    def _():
        xp_ref[...] = jnp.zeros_like(xp_ref)
        xp_ref[1:H + 1, 1:W + 1, :] = x_ref[0]

    row0 = pl.multiple_of(rb * TH, TH)

    # im2col: 9 shifted windows -> one (TH*W, 9*Cin) LHS, then a single K=9*Cin matmul.
    for t in range(9):
        kh, kw = divmod(t, 3)
        win = xp_ref[pl.ds(row0 + kh, TH), kw:kw + W, :].reshape(TH * W, Cin)
        col_ref[:, t * Cin:(t + 1) * Cin] = win

    acc = jnp.dot(col_ref[...], w_ref[...], preferred_element_type=jnp.float32)

    # Epilogue in f32 (bias + PReLU), then a single bf16 cast on the store.
    y = acc + b_ref[...]
    o_ref[0] = jnp.where(y >= 0.0, y, a_ref[...] * y).astype(o_ref.dtype)


def conv3x3_bias_prelu(x_nhwc, w, b, alpha_exp, *, row_block=8):
    N, H, W, Cin = x_nhwc.shape
    Cout = w.shape[-1]

    # Lane-dense / tiling guards (documented assumptions from the review).
    assert Cout % 128 == 0, "Cout = Cin*r^2 must be a multiple of 128 (lane-dense stores)"
    assert (H * W) % 8 == 0, "H*W must be a multiple of 8 (sublane constraint)"

    # Row-block size: must divide H and give a sublane-aligned output block.
    TH = row_block
    if TH <= 0 or H % TH != 0 or (TH * W) % 8 != 0:
        TH = H
    RB = H // TH

    kernel = functools.partial(_conv3x3_bias_prelu_kernel, H=H, W=W, Cin=Cin, TH=TH)
    return pl.pallas_call(
        kernel,
        out_shape=jax.ShapeDtypeStruct((N, H * W, Cout), jnp.bfloat16),
        grid_spec=pltpu.PrefetchScalarGridSpec(
            num_scalar_prefetch=0,
            grid=(N, RB),
            in_specs=[
                # Full (small) image per step; block index only changes with n, so the
                # DMA is skipped across the rb axis.
                pl.BlockSpec((1, H, W, Cin), lambda n, rb: (n, 0, 0, 0)),
                # Grid-invariant weights / bias / PReLU slope.
                pl.BlockSpec((9 * Cin, Cout), lambda n, rb: (0, 0)),
                pl.BlockSpec((1, Cout), lambda n, rb: (0, 0)),
                pl.BlockSpec((1, Cout), lambda n, rb: (0, 0)),
            ],
            out_specs=pl.BlockSpec((1, TH * W, Cout), lambda n, rb: (n, rb, 0)),
            scratch_shapes=[
                pltpu.VMEM((H + 2, W + 2, Cin), jnp.bfloat16),   # padded activation
                pltpu.VMEM((TH * W, 9 * Cin), jnp.bfloat16),     # im2col LHS
            ],
        ),
        compiler_params=pltpu.CompilerParams(
            # Batch axis parallel (megacore / v7x 2-TC), row axis sequential so the
            # padded scratch is filled at rb==0 and reused for the remaining blocks.
            dimension_semantics=("parallel", "arbitrary"),
        ),
    )(x_nhwc, w, b, alpha_exp)


# --------------------------- parameter preparation (outside jit) -------------------
def prepare_params(w_oihw, bias, alpha, scale_factor):
    """PyTorch layouts -> kernel layouts, done once (not in the traced graph)."""
    Cout, Cin, kh, kw = w_oihw.shape
    r = scale_factor
    # (Cout, Cin, 3, 3) -> (kh, kw, Cin, Cout) -> (9*Cin, Cout), bf16 for the MXU.
    # Row order (tap-major, channel-minor) matches the in-kernel im2col columns.
    w = jnp.transpose(w_oihw, (2, 3, 1, 0)).reshape(kh * kw * Cin, Cout)
    w = w.astype(jnp.bfloat16)
    # PReLU slope per *post-shuffle* channel c maps to pre-shuffle channels
    # q = c*r^2 + i*r + j, i.e. slope_exp[q] = alpha[q // r^2].
    alpha_exp = jnp.repeat(alpha.astype(jnp.float32), r * r).reshape(1, Cout)
    return {
        "w": w,
        "b": bias.reshape(1, Cout).astype(jnp.float32),
        "alpha": alpha_exp,
    }


# ----------------------------------- forward ---------------------------------------
@functools.partial(jax.jit, static_argnames=("scale_factor", "row_block"))
def upsample_block_forward(x_nchw, kparams, scale_factor, row_block=8):
    N, Cin, H, W = x_nchw.shape
    r = scale_factor
    Cout = kparams["w"].shape[-1]
    C = Cout // (r * r)                                   # == Cin

    # Cast to bf16 BEFORE the layout change so the NCHW->NHWC transpose moves half
    # the bytes; zero-padding is folded into the kernel (no XLA pad pass).
    x = jnp.transpose(x_nchw.astype(jnp.bfloat16), (0, 2, 3, 1))          # NCHW->NHWC

    y = conv3x3_bias_prelu(x, kparams["w"], kparams["b"], kparams["alpha"],
                           row_block=row_block)
    # y: (N, H*W, C*r*r) bf16, bias + PReLU already applied (pre-shuffle order).
    # PixelShuffle as a pure XLA permutation in bf16; final f32 cast fuses into it.
    y = y.reshape(N, H, W, C, r, r)
    y = jnp.transpose(y, (0, 3, 1, 4, 2, 5)).reshape(N, C, H * r, W * r)
    return y.astype(jnp.float32)


# ------------------------------ pure-JAX reference ---------------------------------
def reference_forward(x_nchw, w_oihw, bias, alpha, r):
    y = jax.lax.conv_general_dilated(
        x_nchw.astype(jnp.float32), w_oihw.astype(jnp.float32),
        window_strides=(1, 1), padding=((1, 1), (1, 1)),
        dimension_numbers=("NCHW", "OIHW", "NCHW"))
    y = y + bias.reshape(1, -1, 1, 1)
    N, Crr, H, W = y.shape
    C = Crr // (r * r)
    y = y.reshape(N, C, r, r, H, W)
    y = jnp.transpose(y, (0, 1, 4, 2, 5, 3)).reshape(N, C, H * r, W * r)
    a = alpha.reshape(1, -1, 1, 1)
    return jnp.where(y >= 0, y, a * y)


# -------------------------------------- main ---------------------------------------
if __name__ == "__main__":
    key = jax.random.PRNGKey(0)
    kx, kw_, kb_, ka_ = jax.random.split(key, 4)

    N, Cin, H, W, r = 2, 32, 16, 16, 2          # Cout = Cin*r^2 = 128 (lane-dense)
    Cout = Cin * r * r

    x = jax.random.normal(kx, (N, Cin, H, W), jnp.float32)
    w_oihw = jax.random.normal(kw_, (Cout, Cin, 3, 3), jnp.float32) / np.sqrt(Cin * 9)
    bias = 0.05 * jax.random.normal(kb_, (Cout,), jnp.float32)
    alpha = 0.25 + 0.05 * jax.random.normal(ka_, (Cin,), jnp.float32)   # PReLU(Cin)

    kparams = prepare_params(w_oihw, bias, alpha, r)

    out = jax.block_until_ready(upsample_block_forward(x, kparams, scale_factor=r))
    assert out.shape == (N, Cin, H * r, W * r), out.shape
    assert bool(jnp.all(jnp.isfinite(out)))

    ref = reference_forward(x, w_oihw, bias, alpha, r)
    # bf16 inputs / weights / kernel output vs. a full-f32 reference: expect ~1e-2
    # scale rounding error (inference-grade, not bit parity with PyTorch).
    max_err = float(jnp.max(jnp.abs(out - ref)))
    mean_err = float(jnp.mean(jnp.abs(out - ref)))
    assert max_err < 1e-1, f"max abs err vs reference: {max_err}"
    assert mean_err < 1e-2, f"mean abs err vs reference: {mean_err}"

    print("KERNEL_OK")
</pallas_src>

<mosaic_0001>
module attributes {stable_mosaic.version = 11 : i64} {
  func.func @_conv3x3_bias_prelu_kernel(%arg0: i32, %arg1: i32, %arg2: memref<1x16x16x32xbf16, #tpu.memory_space<vmem>>, %arg3: memref<288x128xbf16, #tpu.memory_space<vmem>>, %arg4: memref<1x128xf32, #tpu.memory_space<vmem>>, %arg5: memref<1x128xf32, #tpu.memory_space<vmem>>, %arg6: memref<1x128x128xbf16, #tpu.memory_space<vmem>>, %arg7: memref<18x18x32xbf16, #tpu.memory_space<vmem>>, %arg8: memref<128x288xbf16, #tpu.memory_space<vmem>>) attributes {dimension_semantics = [#tpu.dimension_semantics<parallel>, #tpu.dimension_semantics<arbitrary>], iteration_bounds = array<i64: 2, 2>, scalar_prefetch = 0 : i64, scratch_operands = 2 : i64, tpu.core_type = #tpu.core_type<tc>, window_params = [{transform_indices = @transform_0, window_bounds = array<i64: 1, 16, 16, 32>}, {pipeline_mode = #tpu.pipeline_mode<synchronous>, transform_indices = @transform_1, window_bounds = array<i64: 288, 128>}, {pipeline_mode = #tpu.pipeline_mode<synchronous>, transform_indices = @transform_2, window_bounds = array<i64: 1, 128>}, {pipeline_mode = #tpu.pipeline_mode<synchronous>, transform_indices = @transform_3, window_bounds = array<i64: 1, 128>}, {transform_indices = @transform_4, window_bounds = array<i64: 1, 128, 128>}]} {
    %c0_i32 = arith.constant 0 : i32
    %0 = arith.cmpi eq, %arg1, %c0_i32 : i32
    %1 = arith.extui %0 : i1 to i32
    %c0_i32_0 = arith.constant 0 : i32
    %2 = arith.cmpi ne, %1, %c0_i32_0 : i32
    scf.if %2 {
      %cst_45 = arith.constant 0.000000e+00 : bf16
      %66 = vector.broadcast %cst_45 : bf16 to vector<18x18x32xbf16>
      %c0_46 = arith.constant 0 : index
      %c0_47 = arith.constant 0 : index
      %c0_48 = arith.constant 0 : index
      %67 = vector.load %arg7[%c0_46, %c0_47, %c0_48] : memref<18x18x32xbf16, #tpu.memory_space<vmem>>, vector<18x18x32xbf16>
      tpu.vector_store %arg7[%c0_46, %c0_47, %c0_48], %66 {strides = array<i32>} : memref<18x18x32xbf16, #tpu.memory_space<vmem>>, vector<18x18x32xbf16>,
      %c0_49 = arith.constant 0 : index
      %c0_50 = arith.constant 0 : index
      %c0_51 = arith.constant 0 : index
      %c0_52 = arith.constant 0 : index
      %68 = vector.load %arg2[%c0_49, %c0_50, %c0_51, %c0_52] : memref<1x16x16x32xbf16, #tpu.memory_space<vmem>>, vector<1x16x16x32xbf16>
      %69 = vector.shape_cast %68 : vector<1x16x16x32xbf16> to vector<16x16x32xbf16>
      %c1_53 = arith.constant 1 : index
      %c1_54 = arith.constant 1 : index
      %c0_55 = arith.constant 0 : index
      %70 = vector.load %arg7[%c1_53, %c1_54, %c0_55] : memref<18x18x32xbf16, #tpu.memory_space<vmem>>, vector<16x16x32xbf16>
      tpu.vector_store %arg7[%c1_53, %c1_54, %c0_55], %69 {strides = array<i32>} : memref<18x18x32xbf16, #tpu.memory_space<vmem>>, vector<16x16x32xbf16>,
    } else {
    }
    %c8_i32 = arith.constant 8 : i32
    %3 = arith.muli %arg1, %c8_i32 : i32
    %4 = tpu.assume_multiple %3, 8 : i32
    %c0_i32_1 = arith.constant 0 : i32
    %5 = arith.addi %4, %c0_i32_1 : i32
    %6 = arith.index_cast %5 : i32 to index
    %c0 = arith.constant 0 : index
    %c0_2 = arith.constant 0 : index
    %7 = vector.load %arg7[%6, %c0, %c0_2] : memref<18x18x32xbf16, #tpu.memory_space<vmem>>, vector<8x16x32xbf16>
    %8 = vector.shape_cast %7 : vector<8x16x32xbf16> to vector<128x32xbf16>
    %c0_3 = arith.constant 0 : index
    %c0_4 = arith.constant 0 : index
    %9 = vector.load %arg8[%c0_3, %c0_4] : memref<128x288xbf16, #tpu.memory_space<vmem>>, vector<128x32xbf16>
    tpu.vector_store %arg8[%c0_3, %c0_4], %8 {strides = array<i32>} : memref<128x288xbf16, #tpu.memory_space<vmem>>, vector<128x32xbf16>,
    %c0_i32_5 = arith.constant 0 : i32
    %10 = arith.addi %4, %c0_i32_5 : i32
    %11 = arith.index_cast %10 : i32 to index
    %c1 = arith.constant 1 : index
    %c0_6 = arith.constant 0 : index
    %12 = vector.load %arg7[%11, %c1, %c0_6] : memref<18x18x32xbf16, #tpu.memory_space<vmem>>, vector<8x16x32xbf16>
    %13 = vector.shape_cast %12 : vector<8x16x32xbf16> to vector<128x32xbf16>
    %c0_7 = arith.constant 0 : index
    %c32 = arith.constant 32 : index
    %14 = vector.load %arg8[%c0_7, %c32] : memref<128x288xbf16, #tpu.memory_space<vmem>>, vector<128x32xbf16>
    tpu.vector_store %arg8[%c0_7, %c32], %13 {strides = array<i32>} : memref<128x288xbf16, #tpu.memory_space<vmem>>, vector<128x32xbf16>,
    %c0_i32_8 = arith.constant 0 : i32
    %15 = arith.addi %4, %c0_i32_8 : i32
    %16 = arith.index_cast %15 : i32 to index
    %c2 = arith.constant 2 : index
    %c0_9 = arith.constant 0 : index
    %17 = vector.load %arg7[%16, %c2, %c0_9] : memref<18x18x32xbf16, #tpu.memory_space<vmem>>, vector<8x16x32xbf16>
    %18 = vector.shape_cast %17 : vector<8x16x32xbf16> to vector<128x32xbf16>
    %c0_10 = arith.constant 0 : index
    %c64 = arith.constant 64 : index
    %19 = vector.load %arg8[%c0_10, %c64] : memref<128x288xbf16, #tpu.memory_space<vmem>>, vector<128x32xbf16>
    tpu.vector_store %arg8[%c0_10, %c64], %18 {strides = array<i32>} : memref<128x288xbf16, #tpu.memory_space<vmem>>, vector<128x32xbf16>,
    %c1_i32 = arith.constant 1 : i32
    %20 = arith.addi %4, %c1_i32 : i32
    %21 = arith.index_cast %20 : i32 to index
    %c0_11 = arith.constant 0 : index
    %c0_12 = arith.constant 0 : index
    %22 = vector.load %arg7[%21, %c0_11, %c0_12] : memref<18x18x32xbf16, #tpu.memory_space<vmem>>, vector<8x16x32xbf16>
    %23 = vector.shape_cast %22 : vector<8x16x32xbf16> to vector<128x32xbf16>
    %c0_13 = arith.constant 0 : index
    %c96 = arith.constant 96 : index
    %24 = vector.load %arg8[%c0_13, %c96] : memref<128x288xbf16, #tpu.memory_space<vmem>>, vector<128x32xbf16>
    tpu.vector_store %arg8[%c0_13, %c96], %23 {strides = array<i32>} : memref<128x288xbf16, #tpu.memory_space<vmem>>, vector<128x32xbf16>,
    %c1_i32_14 = arith.constant 1 : i32
    %25 = arith.addi %4, %c1_i32_14 : i32
    %26 = arith.index_cast %25 : i32 to index
    %c1_15 = arith.constant 1 : index
    %c0_16 = arith.constant 0 : index
    %27 = vector.load %arg7[%26, %c1_15, %c0_16] : memref<18x18x32xbf16, #tpu.memory_space<vmem>>, vector<8x16x32xbf16>
    %28 = vector.shape_cast %27 : vector<8x16x32xbf16> to vector<128x32xbf16>
    %c0_17 = arith.constant 0 : index
    %c128 = arith.constant 128 : index
    %29 = vector.load %arg8[%c0_17, %c128] : memref<128x288xbf16, #tpu.memory_space<vmem>>, vector<128x32xbf16>
    tpu.vector_store %arg8[%c0_17, %c128], %28 {strides = array<i32>} : memref<128x288xbf16, #tpu.memory_space<vmem>>, vector<128x32xbf16>,
    %c1_i32_18 = arith.constant 1 : i32
    %30 = arith.addi %4, %c1_i32_18 : i32
    %31 = arith.index_cast %30 : i32 to index
    %c2_19 = arith.constant 2 : index
    %c0_20 = arith.constant 0 : index
    %32 = vector.load %arg7[%31, %c2_19, %c0_20] : memref<18x18x32xbf16, #tpu.memory_space<vmem>>, vector<8x16x32xbf16>
    %33 = vector.shape_cast %32 : vector<8x16x32xbf16> to vector<128x32xbf16>
    %c0_21 = arith.constant 0 : index
    %c160 = arith.constant 160 : index
    %34 = vector.load %arg8[%c0_21, %c160] : memref<128x288xbf16, #tpu.memory_space<vmem>>, vector<128x32xbf16>
    tpu.vector_store %arg8[%c0_21, %c160], %33 {strides = array<i32>} : memref<128x288xbf16, #tpu.memory_space<vmem>>, vector<128x32xbf16>,
    %c2_i32 = arith.constant 2 : i32
    %35 = arith.addi %4, %c2_i32 : i32
    %36 = arith.index_cast %35 : i32 to index
    %c0_22 = arith.constant 0 : index
    %c0_23 = arith.constant 0 : index
    %37 = vector.load %arg7[%36, %c0_22, %c0_23] : memref<18x18x32xbf16, #tpu.memory_space<vmem>>, vector<8x16x32xbf16>
    %38 = vector.shape_cast %37 : vector<8x16x32xbf16> to vector<128x32xbf16>
    %c0_24 = arith.constant 0 : index
    %c192 = arith.constant 192 : index
    %39 = vector.load %arg8[%c0_24, %c192] : memref<128x288xbf16, #tpu.memory_space<vmem>>, vector<128x32xbf16>
    tpu.vector_store %arg8[%c0_24, %c192], %38 {strides = array<i32>} : memref<128x288xbf16, #tpu.memory_space<vmem>>, vector<128x32xbf16>,
    %c2_i32_25 = arith.constant 2 : i32
    %40 = arith.addi %4, %c2_i32_25 : i32
    %41 = arith.index_cast %40 : i32 to index
    %c1_26 = arith.constant 1 : index
    %c0_27 = arith.constant 0 : index
    %42 = vector.load %arg7[%41, %c1_26, %c0_27] : memref<18x18x32xbf16, #tpu.memory_space<vmem>>, vector<8x16x32xbf16>
    %43 = vector.shape_cast %42 : vector<8x16x32xbf16> to vector<128x32xbf16>
    %c0_28 = arith.constant 0 : index
    %c224 = arith.constant 224 : index
    %44 = vector.load %arg8[%c0_28, %c224] : memref<128x288xbf16, #tpu.memory_space<vmem>>, vector<128x32xbf16>
    tpu.vector_store %arg8[%c0_28, %c224], %43 {strides = array<i32>} : memref<128x288xbf16, #tpu.memory_space<vmem>>, vector<128x32xbf16>,
    %c2_i32_29 = arith.constant 2 : i32
    %45 = arith.addi %4, %c2_i32_29 : i32
    %46 = arith.index_cast %45 : i32 to index
    %c2_30 = arith.constant 2 : index
    %c0_31 = arith.constant 0 : index
    %47 = vector.load %arg7[%46, %c2_30, %c0_31] : memref<18x18x32xbf16, #tpu.memory_space<vmem>>, vector<8x16x32xbf16>
    %48 = vector.shape_cast %47 : vector<8x16x32xbf16> to vector<128x32xbf16>
    %c0_32 = arith.constant 0 : index
    %c256 = arith.constant 256 : index
    %49 = vector.load %arg8[%c0_32, %c256] : memref<128x288xbf16, #tpu.memory_space<vmem>>, vector<128x32xbf16>
    tpu.vector_store %arg8[%c0_32, %c256], %48 {strides = array<i32>} : memref<128x288xbf16, #tpu.memory_space<vmem>>, vector<128x32xbf16>,
    %c0_33 = arith.constant 0 : index
    %c0_34 = arith.constant 0 : index
    %50 = vector.load %arg8[%c0_33, %c0_34] : memref<128x288xbf16, #tpu.memory_space<vmem>>, vector<128x288xbf16>
    %c0_35 = arith.constant 0 : index
    %c0_36 = arith.constant 0 : index
    %51 = vector.load %arg3[%c0_35, %c0_36] : memref<288x128xbf16, #tpu.memory_space<vmem>>, vector<288x128xbf16>
    %cst = arith.constant dense<0.000000e+00> : vector<128x128xf32>
    %52 = tpu.matmul %50, %51, %cst {dimension_numbers = #tpu.dot_dimension_numbers<[1], [0], [0], [1], [0, 0, 1, 1], [], []>} : vector<128x288xbf16>, vector<288x128xbf16>, vector<128x128xf32> -> vector<128x128xf32>
    %c0_37 = arith.constant 0 : index
    %c0_38 = arith.constant 0 : index
    %53 = vector.load %arg4[%c0_37, %c0_38] : memref<1x128xf32, #tpu.memory_space<vmem>>, vector<1x128xf32>
    %54 = vector.broadcast %53 : vector<1x128xf32> to vector<128x128xf32>
    %55 = arith.addf %52, %54 : vector<128x128xf32>
    %cst_39 = arith.constant 0.000000e+00 : f32
    %56 = vector.broadcast %cst_39 : f32 to vector<128x128xf32>
    %57 = arith.cmpf oge, %55, %56 : vector<128x128xf32>
    %c0_40 = arith.constant 0 : index
    %c0_41 = arith.constant 0 : index
    %58 = vector.load %arg5[%c0_40, %c0_41] : memref<1x128xf32, #tpu.memory_space<vmem>>, vector<1x128xf32>
    %59 = vector.broadcast %58 : vector<1x128xf32> to vector<128x128xf32>
    %60 = arith.mulf %59, %55 : vector<128x128xf32>
    %61 = arith.select %57, %55, %60 : vector<128x128xi1>, vector<128x128xf32>
    %62 = arith.truncf %61 : vector<128x128xf32> to vector<128x128xbf16>
    %c0_42 = arith.constant 0 : index
    %c0_43 = arith.constant 0 : index
    %c0_44 = arith.constant 0 : index
    %63 = vector.load %arg6[%c0_42, %c0_43, %c0_44] : memref<1x128x128xbf16, #tpu.memory_space<vmem>>, vector<1x128x128xbf16>
    %64 = vector.shape_cast %63 : vector<1x128x128xbf16> to vector<128x128xbf16>
    %65 = vector.shape_cast %62 : vector<128x128xbf16> to vector<1x128x128xbf16>
    tpu.vector_store %arg6[%c0_42, %c0_43, %c0_44], %65 {strides = array<i32>} : memref<1x128x128xbf16, #tpu.memory_space<vmem>>, vector<1x128x128xbf16>,
    return
  }
  func.func @transform_0(%arg0: i32, %arg1: i32) -> (i32, i32, i32, i32) {
    %c0_i32 = arith.constant 0 : i32
    %c0_i32_0 = arith.constant 0 : i32
    %c0_i32_1 = arith.constant 0 : i32
    %c0_i32_2 = arith.constant 0 : i32
    return %arg0, %c0_i32, %c0_i32_0, %c0_i32_1 : i32, i32, i32, i32
  }
  func.func @transform_1(%arg0: i32, %arg1: i32) -> (i32, i32) {
    %c0_i32 = arith.constant 0 : i32
    %c0_i32_0 = arith.constant 0 : i32
    %c0_i32_1 = arith.constant 0 : i32
    return %c0_i32, %c0_i32_0 : i32, i32
  }
  func.func @transform_2(%arg0: i32, %arg1: i32) -> (i32, i32) {
    %c0_i32 = arith.constant 0 : i32
    %c0_i32_0 = arith.constant 0 : i32
    %c0_i32_1 = arith.constant 0 : i32
    return %c0_i32, %c0_i32_0 : i32, i32
  }
  func.func @transform_3(%arg0: i32, %arg1: i32) -> (i32, i32) {
    %c0_i32 = arith.constant 0 : i32
    %c0_i32_0 = arith.constant 0 : i32
    %c0_i32_1 = arith.constant 0 : i32
    return %c0_i32, %c0_i32_0 : i32, i32
  }
  func.func @transform_4(%arg0: i32, %arg1: i32) -> (i32, i32, i32) {
    %c0_i32 = arith.constant 0 : i32
    %c0_i32_0 = arith.constant 0 : i32
    return %arg0, %arg1, %c0_i32 : i32, i32, i32
  }
}

</mosaic_0001>

<bundles_post_ra>
// kernel: upsample_block_forward.1
= control target key start
LH: loop header
LB: loop body
LE: loop exit
PB: predicated region body
PF: predicated region fallthrough
CT: control target
= control target key end

     0   :  { %9 = vsyncpa [#allocation5], 0  ;;  %s4719_s0 = inlined_call_operand.vmem [shape: bf16[2,16,16,32], index: 0, kind: input, shape index: {}]   ;;  %s4720_s1 = inlined_call_operand.hbm [shape: bf16[288,128], index: 1, kind: input, shape index: {}]   ;;  %s4721_s2 = inlined_call_operand.hbm [shape: f32[1,128], index: 2, kind: input, shape index: {}]   ;;  %s4722_s3 = inlined_call_operand.hbm [shape: f32[1,128], index: 3, kind: input, shape index: {}]   ;;  %s4723_s4 = inlined_call_operand.vmem [shape: bf16[2,256,128], index: 4, kind: output, shape index: {}]  }
   0x1   :  { %10 = vsyncpa [#allocation7], 0  ;;  %s3737_s15 = smov 0   ;;  %s3739_s16 = smov 0  }
   0x2   :  { %s3741_s17 = smov 0   ;;  %s3743_s18 = smov 0  }
   0x3   :  { %s3745_s19 = smov 0  }
   0x4 LB: > { %s3703_s20 = smov [#allocation6]   ;;  %s2982_s22 = sadd.s32 4294967295, %s3701_s19   ;;  %s3701_s19 = sphi %s3745_s19, %s16_s19   ;;  %s3697_s18 = sphi %s3743_s18, %s4749_s18   ;;  %s3693_s17 = sphi %s3741_s17, %s4748_s17   ;;  %s3689_s16 = sphi %s3739_s16, %s4747_s16   ;;  %s3685_s15 = sphi %s3737_s15, %s4746_s15  }
   0x5   : > { %s176_s21 = sshll.u32 %s3703_s20, 4  ;;  %p2984_p0 = scmp.ge.s32.totalorder %s3701_s19, 1  ;;  %s177_s21 = int_to_ptr.vmem [resolvable:$true] %s176_s21 }
   0x6   : > { %p150_p1 = scmp.lt.s32.totalorder %s3701_s19, 5  ;;  %p3765_p2 = scmp.eq.s32.totalorder %s2982_s22, 0 }
   0x7   : > { %s25_s26 = sadd.s32 1, %s3693_s17  ;;  %s3571_s30 = scalar_lea.hbm %s4721_s2, 16 }
   0x8   : > { %s4728_s23 = scalar_select %p3765_p2, 1, 0 }
   0x9   : > { %p3769_p3 = pnand %p2984_p0, %p150_p1  ;;  %p3782_p6 = scmp.ge.s32.totalorder %s25_s26, 2 }
   0xa   : > { %p3572_p7 = scmp.ne.s32.totalorder %s4721_s2, %s3571_s30  ;;  %p3578_p11 = scmp.lt.u32.totalorder %s3571_s30, %s4721_s2 }
   0xb   : > { %s4729_s24 = scalar_select %p3769_p3, 1, 0 }
   0xc   : > { %p3463_p4 = pneg %p3769_p3 }
   0xd   : > { %s4731_s27 = scalar_select %p3782_p6, 1, 0 }
   0xe   : > { %p3777_p5 = pnand %p3765_p2, %p3463_p4 }
  0x10   : > { %p3794_p8 = pneg %p3777_p5 }
  0x12   : > { %p3574_p9 = pnand %p3794_p8, %p3572_p7 }
  0x14   : > { %p3575_p10 = pneg %p3574_p9 }
  0x16   : > { %p3580_p12 = pnand %p3578_p11, %p3575_p10 }
  0x18   : > { %3583 = shalt.err (!%p3580_p12)
}
  0x19   : > { %s3584_s10 = scalar_lea.vmem %s177_s21, 16  ;;  %s3591_s11 = scalar_lea.vmem %s177_s21, 32 }
  0x1a   : > { %p3585_p13 = scmp.ne.s32.totalorder %s177_s21, %s3584_s10  ;;  %p3592_p4 = scmp.lt.s32.totalorder %s177_s21, %s177_s21 }
  0x1b   : > { %p3593_p2 = scmp.lt.s32.totalorder %s3591_s11, %s3584_s10 }
  0x1c   : > { %p3587_p0 = pnand %p3585_p13, %p3794_p8 }
  0x1d   : > { %p3594_p3 = por %p3593_p2, %p3592_p4 }
  0x1e   : > { %p3588_p1 = pneg %p3587_p0 }
  0x20   : > { %p3595_p6 = pnand %p3594_p3, %p3588_p1 }
  0x22   : > { %3598 = shalt.err (!%p3595_p6)
}
  0x23   : > { %3469 = dma.hbm_to_vmem [thread:$0]  (!%p3777_p5), %s4721_s2, 16, %s177_s21, [#allocation7]  }
  0x24   : > { %p4733_p7 = scmp.ne.s32.totalorder %s4731_s27, 0  ;;  %s28_s14 = sadd.s32 1, %s3697_s18 }
  0x25   : > { %s3704_s20 = smov [#allocation4]   ;;  %s3599_s30 = scalar_lea.hbm %s4720_s1, 2304 }
  0x26   : > { %s4751_s26 = smov (%p4733_p7, %s25_s26), 0  ;;  %s4753_s14 = smov (!%p4733_p7, %s28_s14), %s3697_s18 }
  0x27   : > { %s162_s22 = sshll.u32 %s3704_s20, 4  ;;  %p30_p2 = scmp.ge.s32.totalorder %s4753_s14, 2  ;;  %s163_s22 = int_to_ptr.vmem [resolvable:$true] %s162_s22 }
  0x28   : > { %p3600_p3 = scmp.ne.s32.totalorder %s4720_s1, %s3599_s30  ;;  %p3606_p10 = scmp.lt.u32.totalorder %s3599_s30, %s4720_s1 }
  0x29   : > { %s4755_s14 = smov (%p30_p2, %s4753_s14), 0 }
  0x2a   : > { %p3602_p6 = pnand %p3600_p3, %p3794_p8 }
  0x2c   : > { %p3603_p9 = pneg %p3602_p6 }
  0x2e   : > { %p3608_p11 = pnand %p3606_p10, %p3603_p9 }
  0x30   : > { %3611 = shalt.err (!%p3608_p11)
}
  0x31   : > { %s3612_s8 = scalar_lea.vmem %s163_s22, 2304  ;;  %p3620_p1 = scmp.lt.s32.totalorder %s163_s22, %s163_s22 }
  0x32   : > { %p3613_p12 = scmp.ne.s32.totalorder %s163_s22, %s3612_s8  ;;  %p3621_p4 = scmp.lt.s32.totalorder %s3612_s8, %s3612_s8 }
  0x34   : > { %p3615_p13 = pnand %p3613_p12, %p3794_p8  ;;  %p3622_p7 = por %p3621_p4, %p3620_p1 }
  0x36   : > { %p3616_p0 = pneg %p3615_p13 }
  0x38   : > { %p3623_p2 = pnand %p3622_p7, %p3616_p0 }
  0x3a   : > { %3626 = shalt.err (!%p3623_p2)
}
  0x3b   : > { %s3705_s9 = smov 64   ;;  %s3706_s10 = smov 4  }
  0x3c   : > { %3466 = dma.hbm_to_vmem [thread:$0]  (!%p3777_p5), %s4720_s1, 2304, %s163_s22, [#allocation5], %s3705_s9, %s3705_s9, %s3706_s10  }
  0x3d   : > { %s3707_s13 = smov [#allocation8]   ;;  %s3627_s30 = scalar_lea.hbm %s4722_s3, 16 }
  0x3e   : > { %s187_s20 = sshll.u32 %s3707_s13, 4  ;;  %p3628_p3 = scmp.ne.s32.totalorder %s4722_s3, %s3627_s30  ;;  %s188_s20 = int_to_ptr.vmem [resolvable:$true] %s187_s20 }
  0x3f   : > { %p3634_p10 = scmp.lt.u32.totalorder %s3627_s30, %s4722_s3 }
  0x40   : > { %p3630_p6 = pnand %p3628_p3, %p3794_p8 }
  0x42   : > { %p3631_p9 = pneg %p3630_p6 }
  0x44   : > { %p3636_p11 = pnand %p3634_p10, %p3631_p9 }
  0x46   : > { %3639 = shalt.err (!%p3636_p11)
}
  0x47   : > { %s3640_s22 = scalar_lea.vmem %s188_s20, 16  ;;  %s3647_s8 = scalar_lea.vmem %s188_s20, 32 }
  0x48   : > { %p3641_p12 = scmp.ne.s32.totalorder %s188_s20, %s3640_s22  ;;  %p3648_p1 = scmp.lt.s32.totalorder %s188_s20, %s188_s20 }
  0x49   : > { %p3649_p4 = scmp.lt.s32.totalorder %s3647_s8, %s3640_s22 }
  0x4a   : > { %p3643_p13 = pnand %p3641_p12, %p3794_p8 }
  0x4b   : > { %p3650_p7 = por %p3649_p4, %p3648_p1 }
  0x4c   : > { %p3644_p0 = pneg %p3643_p13 }
  0x4e   : > { %p3651_p2 = pnand %p3650_p7, %p3644_p0 }
  0x50   : > { %3654 = shalt.err (!%p3651_p2)
}
  0x51   : > { %3472 = dma.hbm_to_vmem [thread:$0]  (!%p3777_p5), %s4722_s3, 16, %s188_s20, [#allocation7]  }
  0x52   : > { %p4734_p3 = scmp.ne.s32.totalorder %s4729_s24, 0 }
  0x53   : > { %p4735_p6 = scmp.ne.s32.totalorder (!%p4734_p3), %s4728_s23, 0 }
  0x54   : > { %208 = sbr.rel (%p4734_p3) target bundleno = 645 (0x285), region = 36 }
  0x5b   : > { %3676 = dma.done.wait (%p4735_p6), [#allocation5], 2304  }
  0x5c   : > { %3678 = vsyncadd (%p4735_p6), [#allocation5], 4294964992 }
  0x5d   : > { %3680 = dma.done.wait (%p4735_p6), [#allocation7], 32  }
  0x5e   : > { %3682 = vsyncadd (%p4735_p6), [#allocation7], 4294967264  ;;  %p246_p8 = scmp.lt.s32.totalorder %s3689_s16, 1  ;;  %s2995_s25 = sshll.u32 %s3685_s15, 4 }
  0x5f   : > { %p254_p5 = scmp.lt.s32.totalorder %s2995_s25, 31  ;;  %p2998_p9 = scmp.ne.s32.totalorder %s3685_s15, 0 }
  0x60   : > { %s4757_s16 = smov (!%p246_p8, %s3689_s16), 1  ;;  %vm266_vm0 = vcmask (!%p2998_p9), 257024   ;;  %vm269_vm1 = vcmask (!%p2998_p9), 253952   ;;  %v3708_v1 = vmov (!%p2998_p9), 0   ;;  %vm679_vm2 = vsmask.f32 (!%p2998_p9), 7938 }
  0x61   : > { %s4759_s25 = smov (!%p254_p5, %s2995_s25), 31  ;;  %s3276_s24 = sshll.u32 %s4757_s16, 7  ;;  %271 = vst.msk [vmem:[#allocation2 + $0xc] sm:$0xf] (!%p2998_p9), %vm266_vm0, %v3708_v1  ;;  %267 = vst.msk [vmem:[#allocation2] sm:$0xf] (!%p2998_p9), %vm266_vm0, %v3708_v1 }
  0x62   : > { %s2996_s7 = sshll.u32 %s4757_s16, 5  ;;  %s3872_s13 = scalar_lea.vmem %s4719_s0, %s3276_s24  ;;  %268 = vst.msk [vmem:[#allocation2 + $0x4] sm:$0xf] (!%p2998_p9), %vm266_vm0, %v3708_v1  ;;  %272 = vst.msk [vmem:[#allocation2 + $0x10] sm:$0xf] (!%p2998_p9), %vm266_vm0, %v3708_v1 }
  0x63   : > { %s257_s20 = sadd.s32 %s2996_s7, %s4759_s25  ;;  %265 = sbr.rel (%p2998_p9) target bundleno = 182 (0xb6), region = 52  ;;  %v3881_v0 = vld [vmem:[%s3872_s13] sm:$0xf] (!%p2998_p9)  ;;  %274 = vst.msk [vmem:[#allocation2 + $0x18] sm:$0xf] (!%p2998_p9), %vm266_vm0, %v3708_v1  ;;  %vm3943_vm5 = vmand (!%p2998_p9), %vm266_vm0, %vm679_vm2 }
  0x64   : > { %s2997_s28 = sshll.u32 %s257_s20, 2  ;;  %275 = vst.msk [vmem:[#allocation2 + $0x1c] sm:$0xf] (!%p2998_p9), %vm266_vm0, %v3708_v1  ;;  %277 = vst.msk [vmem:[#allocation2 + $0x24] sm:$0xf] (!%p2998_p9), %vm266_vm0, %v3708_v1  ;;  %v358_v2 = vshrl.u32 (!%p2998_p9), %v3881_v0, 16 }
  0x65   : > { %s3877_s30 = scalar_lea.vmem %s4723_s4, %s2997_s28  ;;  %278 = vst.msk [vmem:[#allocation2 + $0x28] sm:$0xf] (!%p2998_p9), %vm266_vm0, %v3708_v1  ;;  %280 = vst.msk [vmem:[#allocation2 + $0x30] sm:$0xf] (!%p2998_p9), %vm266_vm0, %v3708_v1  ;;  %v361_v3 = vshll.u32 (!%p2998_p9), %v3881_v0, 16 }
  0x66   : > { %281 = vst.msk [vmem:[#allocation2 + $0x34] sm:$0xf] (!%p2998_p9), %vm266_vm0, %v3708_v1  ;;  %283 = vst.msk [vmem:[#allocation2 + $0x3c] sm:$0xf] (!%p2998_p9), %vm266_vm0, %v3708_v1  ;;  %v323_v4 = vld [vmem:[%s3872_s13 + $0x4] sm:$0xf] (!%p2998_p9) }
  0x67   : > { %284 = vst.msk [vmem:[#allocation2 + $0x40] sm:$0xf] (!%p2998_p9), %vm266_vm0, %v3708_v1  ;;  %286 = vst.msk [vmem:[#allocation2 + $0x48] sm:$0xf] (!%p2998_p9), %vm266_vm0, %v3708_v1  ;;  %vm354_vm3 = vsmask.f32 (!%p2998_p9), 256 }
  0x68   : > { %287 = vst.msk [vmem:[#allocation2 + $0x4c] sm:$0xf] (!%p2998_p9), %vm266_vm0, %v3708_v1  ;;  %289 = vst.msk [vmem:[#allocation2 + $0x54] sm:$0xf] (!%p2998_p9), %vm266_vm0, %v3708_v1  ;;  %vm355_vm4 = vsmask.f32 (!%p2998_p9), 4368 }
  0x69   : > { %290 = vst.msk [vmem:[#allocation2 + $0x58] sm:$0xf] (!%p2998_p9), %vm266_vm0, %v3708_v1  ;;  %292 = vst.msk [vmem:[#allocation2 + $0x60] sm:$0xf] (!%p2998_p9), %vm266_vm0, %v3708_v1  ;;  %v366_v5 = vshrl.u32 (!%p2998_p9), %v323_v4, 16  ;;  %v369_v6 = vshll.u32 (!%p2998_p9), %v323_v4, 16 }
  0x6a   : > { %293 = vst.msk [vmem:[#allocation2 + $0x64] sm:$0xf] %vm266_vm0, %v3708_v1  ;;  %295 = vst.msk [vmem:[#allocation2 + $0x6c] sm:$0xf] %vm266_vm0, %v3708_v1  ;;  %v360_v7 = vrot.slane %v358_v2, 7 }
  0x6b   : > { %296 = vst.msk [vmem:[#allocation2 + $0x70] sm:$0xf] %vm266_vm0, %v3708_v1  ;;  %298 = vst.msk [vmem:[#allocation2 + $0x78] sm:$0xf] %vm266_vm0, %v3708_v1  ;;  %v324_v8 = vld [vmem:[%s3872_s13 + $0x8] sm:$0xf] }
  0x6c   : > { %299 = vst.msk [vmem:[#allocation2 + $0x7c] sm:$0xf] %vm266_vm0, %v3708_v1  ;;  %301 = vst.msk [vmem:[#allocation2 + $0x84] sm:$0xf] %vm266_vm0, %v3708_v1  ;;  %v325_v9 = vld [vmem:[%s3872_s13 + $0xc] sm:$0xf]  ;;  %v363_v16 = vor.u32 %v361_v3, %v360_v7 }
  0x6d   : > { %302 = vst.msk [vmem:[#allocation2 + $0x88] sm:$0xf] %vm266_vm0, %v3708_v1  ;;  %304 = vst.msk [vmem:[#allocation2 + $0x90] sm:$0xf] %vm266_vm0, %v3708_v1  ;;  %v368_v11 = vrot.slane %v366_v5, 7  ;;  %v375_v12 = vshrl.u32 %v324_v8, 16 }
  0x6e   : > { %305 = vst.msk [vmem:[#allocation2 + $0x94] sm:$0xf] %vm266_vm0, %v3708_v1  ;;  %307 = vst.msk [vmem:[#allocation2 + $0x9c] sm:$0xf] %vm266_vm0, %v3708_v1  ;;  %v378_v13 = vshll.u32 %v324_v8, 16  ;;  %v383_v14 = vshrl.u32 %v325_v9, 16 }
  0x6f   : > { %308 = vst.msk [vmem:[#allocation2 + $0xa0] sm:$0xf] %vm266_vm0, %v3708_v1  ;;  %310 = vst.msk [vmem:[#allocation2 + $0xa8] sm:$0xf] %vm266_vm0, %v3708_v1  ;;  %v326_v15 = vld [vmem:[%s3872_s13 + $0x10] sm:$0xf]  ;;  %v371_v22 = vor.u32 %v369_v6, %v368_v11 }
  0x70   : > { %311 = vst.msk [vmem:[#allocation2 + $0xac] sm:$0xf] %vm266_vm0, %v3708_v1  ;;  %313 = vst.msk [vmem:[#allocation2 + $0xb4] sm:$0xf] %vm266_vm0, %v3708_v1  ;;  %v364_v18 = vrot.slane %v360_v7, 4  ;;  %v386_v19 = vshll.u32 %v325_v9, 16 }
  0x71   : > { %314 = vst.msk [vmem:[#allocation2 + $0xb8] sm:$0xf] %vm266_vm0, %v3708_v1  ;;  %316 = vst.msk [vmem:[#allocation2 + $0xc0] sm:$0xf] %vm266_vm0, %v3708_v1  ;;  %v392_v20 = vshrl.u32 %v326_v15, 16  ;;  %v373_v23 = vrot.slane %v368_v11, 4 }
  0x72   : > { %317 = vst.msk [vmem:[#allocation2 + $0xc4] sm:$0xf] %vm266_vm0, %v3708_v1  ;;  %319 = vst.msk [vmem:[#allocation2 + $0xcc] sm:$0xf] %vm266_vm0, %v3708_v1  ;;  %v327_v21 = vld [vmem:[%s3872_s13 + $0x14] sm:$0xf] }
  0x73   : > { %320 = vst.msk [vmem:[#allocation2 + $0xd0] sm:$0xf] %vm266_vm0, %v3708_v1  ;;  %vm3949_vm6 = vmor %vm354_vm3, %vm355_vm4  ;;  %v377_v25 = vrot.slane %v375_v12, 7  ;;  %v385_v26 = vrot.slane %v383_v14, 7  ;;  %v328_v27 = vld [vmem:[%s3872_s13 + $0x18] sm:$0xf] }
  0x74   : > { %273 = vst.msk [vmem:[#allocation2 + $0x14] sm:$0x1] %vm269_vm1, %v3708_v1  ;;  %270 = vst.msk [vmem:[#allocation2 + $0x8] sm:$0x1] %vm269_vm1, %v3708_v1  ;;  %v394_v28 = vrot.slane %v392_v20, 7  ;;  %v395_v29 = vshll.u32 %v326_v15, 16  ;;  %v372_v34 = vsel %vm3949_vm6, %v364_v18, %v371_v22 }
  0x75   : > { %276 = vst.msk [vmem:[#allocation2 + $0x20] sm:$0x1] %vm269_vm1, %v3708_v1  ;;  %279 = vst.msk [vmem:[#allocation2 + $0x2c] sm:$0x1] %vm269_vm1, %v3708_v1  ;;  %v400_v30 = vshrl.u32 %v327_v21, 16  ;;  %v403_v31 = vshll.u32 %v327_v21, 16  ;;  %v380_v36 = vor.u32 %v378_v13, %v377_v25  ;;  %v388_v38 = vor.u32 %v386_v19, %v385_v26 }
  0x76   : > { %282 = vst.msk [vmem:[#allocation2 + $0x38] sm:$0x1] %vm269_vm1, %v3708_v1  ;;  %285 = vst.msk [vmem:[#allocation2 + $0x44] sm:$0x1] %vm269_vm1, %v3708_v1  ;;  %v329_v32 = vld [vmem:[%s3872_s13 + $0x1c] sm:$0xf]  ;;  %v397_v46 = vor.u32 %v395_v29, %v394_v28 }
  0x77   : > { %288 = vst.msk [vmem:[#allocation2 + $0x50] sm:$0x1] %vm269_vm1, %v3708_v1  ;;  %291 = vst.msk [vmem:[#allocation2 + $0x5c] sm:$0x1] %vm269_vm1, %v3708_v1  ;;  %v681_v33 = vld [vmem:[#allocation2 + $0xc] sm:$0xf] }
  0x78   : > { %294 = vst.msk [vmem:[#allocation2 + $0x68] sm:$0x1] %vm269_vm1, %v3708_v1  ;;  %297 = vst.msk [vmem:[#allocation2 + $0x74] sm:$0x1] %vm269_vm1, %v3708_v1  ;;  %v690_v37 = vld [vmem:[#allocation2 + $0x18] sm:$0xf]  ;;  %v682_v39 = vsel %vm3943_vm5, %v363_v16, %v681_v33 }
  0x79   : > { %300 = vst.msk [vmem:[#allocation2 + $0x80] sm:$0x1] %vm269_vm1, %v3708_v1  ;;  %303 = vst.msk [vmem:[#allocation2 + $0x8c] sm:$0x1] %vm269_vm1, %v3708_v1  ;;  %v381_v41 = vrot.slane %v377_v25, 4  ;;  %v390_v42 = vrot.slane %v385_v26, 4  ;;  %v691_v45 = vsel %vm3943_vm5, %v380_v36, %v690_v37 }
  0x7a   : > { %306 = vst.msk [vmem:[#allocation2 + $0x98] sm:$0x1] %vm269_vm1, %v3708_v1  ;;  %309 = vst.msk [vmem:[#allocation2 + $0xa4] sm:$0x1] %vm269_vm1, %v3708_v1  ;;  %v697_v44 = vld [vmem:[#allocation2 + $0x24] sm:$0xf] }
  0x7b   : > { %312 = vst.msk [vmem:[#allocation2 + $0xb0] sm:$0x1] %vm269_vm1, %v3708_v1  ;;  %315 = vst.msk [vmem:[#allocation2 + $0xbc] sm:$0x1] %vm269_vm1, %v3708_v1  ;;  %v687_v35 = vld [vmem:[#allocation2 + $0x14] sm:$0x1]  ;;  %v389_v49 = vsel %vm3949_vm6, %v381_v41, %v388_v38  ;;  %v698_v55 = vsel %vm3943_vm5, %v397_v46, %v697_v44 }
  0x7c   : > { %318 = vst.msk [vmem:[#allocation2 + $0xc8] sm:$0x1] %vm269_vm1, %v3708_v1  ;;  %321 = vst.msk [vmem:[#allocation2 + $0xd4] sm:$0x1] %vm269_vm1, %v3708_v1  ;;  %v694_v43 = vld [vmem:[#allocation2 + $0x20] sm:$0x1] }
  0x7d   : > { %vm3956_vm7 = vmand %vm269_vm1, %vm354_vm3  ;;  %684 = vst.msk [vmem:[#allocation2 + $0x10] sm:$0xf] %vm266_vm0, %v372_v34  ;;  %v398_v47 = vrot.slane %v394_v28, 4  ;;  %v402_v48 = vrot.slane %v400_v30, 7  ;;  %v701_v51 = vld [vmem:[#allocation2 + $0x2c] sm:$0x1] }
  0x7e   : > { %v688_v40 = vsel %vm3956_vm7, %v373_v23, %v687_v35  ;;  %683 = vst [vmem:[#allocation2 + $0xc] sm:$0xf] %v682_v39  ;;  %692 = vst [vmem:[#allocation2 + $0x18] sm:$0xf] %v691_v45  ;;  %v695_v50 = vsel %vm3956_vm7, %v390_v42, %v694_v43  ;;  %v409_v52 = vshrl.u32 %v328_v27, 16  ;;  %v412_v53 = vshll.u32 %v328_v27, 16 }
  0x7f   : > { %689 = vst [vmem:[#allocation2 + $0x14] sm:$0x1] %v688_v40  ;;  %v330_v54 = vld [vmem:[%s3872_s13 + $0x20] sm:$0xf]  ;;  %693 = vst.msk [vmem:[#allocation2 + $0x1c] sm:$0xf] %vm266_vm0, %v389_v49  ;;  %v405_v56 = vor.u32 %v403_v31, %v402_v48 }
  0x80   : > { %696 = vst [vmem:[#allocation2 + $0x20] sm:$0x1] %v695_v50  ;;  %v407_v57 = vrot.slane %v402_v48, 4  ;;  %v417_v58 = vshrl.u32 %v329_v32, 16  ;;  %v331_v59 = vld [vmem:[%s3872_s13 + $0x24] sm:$0xf] }
  0x81   : > { %699 = vst [vmem:[#allocation2 + $0x24] sm:$0xf] %v698_v55  ;;  %v411_v60 = vrot.slane %v409_v52, 7  ;;  %v704_v61 = vld [vmem:[#allocation2 + $0x30] sm:$0xf]  ;;  %v420_v62 = vshll.u32 %v329_v32, 16  ;;  %v406_v1 = vsel %vm3949_vm6, %v398_v47, %v405_v56 }
  0x82   : > { %v426_v63 = vshrl.u32 %v330_v54, 16  ;;  %v429_v0 = vshll.u32 %v330_v54, 16  ;;  %v702_v2 = vsel %vm3956_vm7, %v407_v57, %v701_v51  ;;  %v419_v3 = vrot.slane %v417_v58, 7  ;;  %v708_v4 = vld [vmem:[#allocation2 + $0x38] sm:$0x1] }
  0x83   : > { %v434_v5 = vshrl.u32 %v331_v59, 16  ;;  %v332_v6 = vld [vmem:[%s3872_s13 + $0x28] sm:$0xf]  ;;  %700 = vst.msk [vmem:[#allocation2 + $0x28] sm:$0xf] %vm266_vm0, %v406_v1  ;;  %v414_v7 = vor.u32 %v412_v53, %v411_v60  ;;  %v415_v8 = vrot.slane %v411_v60, 4 }
  0x84   : > { %703 = vst [vmem:[#allocation2 + $0x2c] sm:$0x1] %v702_v2  ;;  %v428_v9 = vrot.slane %v426_v63, 7  ;;  %v711_v11 = vld [vmem:[#allocation2 + $0x3c] sm:$0xf]  ;;  %v437_v12 = vshll.u32 %v331_v59, 16  ;;  %v422_v13 = vor.u32 %v420_v62, %v419_v3 }
  0x85   : > { %v424_v14 = vrot.slane %v419_v3, 4  ;;  %v436_v15 = vrot.slane %v434_v5, 7  ;;  %v443_v16 = vshrl.u32 %v332_v6, 16  ;;  %v333_v18 = vld [vmem:[%s3872_s13 + $0x2c] sm:$0xf]  ;;  %v705_v19 = vsel %vm3943_vm5, %v414_v7, %v704_v61 }
  0x86   : > { %v431_v20 = vor.u32 %v429_v0, %v428_v9  ;;  %v432_v21 = vrot.slane %v428_v9, 4  ;;  %v715_v22 = vld [vmem:[#allocation2 + $0x44] sm:$0x1]  ;;  %v446_v23 = vshll.u32 %v332_v6, 16  ;;  %v334_v25 = vld [vmem:[%s3872_s13 + $0x30] sm:$0xf]  ;;  %v423_v26 = vsel %vm3949_vm6, %v415_v8, %v422_v13 }
  0x87   : > { %706 = vst [vmem:[#allocation2 + $0x30] sm:$0xf] %v705_v19  ;;  %v709_v27 = vsel %vm3956_vm7, %v424_v14, %v708_v4  ;;  %v439_v28 = vor.u32 %v437_v12, %v436_v15  ;;  %v441_v29 = vrot.slane %v436_v15, 4  ;;  %v335_v30 = vld [vmem:[%s3872_s13 + $0x34] sm:$0xf]  ;;  %v445_v32 = vrot.slane %v443_v16, 7 }
  0x88   : > { %707 = vst.msk [vmem:[#allocation2 + $0x34] sm:$0xf] %vm266_vm0, %v423_v26  ;;  %710 = vst [vmem:[#allocation2 + $0x38] sm:$0x1] %v709_v27  ;;  %v712_v31 = vsel %vm3943_vm5, %v431_v20, %v711_v11  ;;  %v451_v33 = vshrl.u32 %v333_v18, 16  ;;  %v454_v34 = vshll.u32 %v333_v18, 16 }
  0x89   : > { %v336_v35 = vld [vmem:[%s3872_s13 + $0x38] sm:$0xf]  ;;  %713 = vst [vmem:[#allocation2 + $0x3c] sm:$0xf] %v712_v31  ;;  %v440_v36 = vsel %vm3949_vm6, %v432_v21, %v439_v28  ;;  %v716_v37 = vsel %vm3956_vm7, %v441_v29, %v715_v22  ;;  %v718_v38 = vld [vmem:[#allocation2 + $0x48] sm:$0xf]  ;;  %v448_v41 = vor.u32 %v446_v23, %v445_v32 }
  0x8a   : > { %v460_v39 = vshrl.u32 %v334_v25, 16  ;;  %v463_v40 = vshll.u32 %v334_v25, 16  ;;  %714 = vst.msk [vmem:[#allocation2 + $0x40] sm:$0xf] %vm266_vm0, %v440_v36  ;;  %717 = vst [vmem:[#allocation2 + $0x44] sm:$0x1] %v716_v37 }
  0x8b   : > { %v449_v42 = vrot.slane %v445_v32, 4  ;;  %v453_v43 = vrot.slane %v451_v33, 7  ;;  %v468_v44 = vshrl.u32 %v335_v30, 16  ;;  %v337_v45 = vld [vmem:[%s3872_s13 + $0x3c] sm:$0xf]  ;;  %v471_v48 = vshll.u32 %v335_v30, 16 }
  0x8c   : > { %v722_v46 = vld [vmem:[#allocation2 + $0x50] sm:$0x1]  ;;  %v462_v47 = vrot.slane %v460_v39, 7  ;;  %v477_v49 = vshrl.u32 %v336_v35, 16  ;;  %v480_v50 = vshll.u32 %v336_v35, 16  ;;  %v719_v51 = vsel %vm3943_vm5, %v448_v41, %v718_v38 }
  0x8d   : > { %v456_v52 = vor.u32 %v454_v34, %v453_v43  ;;  %v458_v53 = vrot.slane %v453_v43, 4  ;;  %v725_v54 = vld [vmem:[#allocation2 + $0x54] sm:$0xf]  ;;  %v470_v55 = vrot.slane %v468_v44, 7  ;;  %v729_v56 = vld [vmem:[#allocation2 + $0x5c] sm:$0x1] }
  0x8e   : > { %720 = vst [vmem:[#allocation2 + $0x48] sm:$0xf] %v719_v51  ;;  %v465_v57 = vor.u32 %v463_v40, %v462_v47  ;;  %v466_v58 = vrot.slane %v462_v47, 4  ;;  %v479_v59 = vrot.slane %v477_v49, 7  ;;  %v485_v60 = vshrl.u32 %v337_v45, 16 }
  0x8f   : > { %v338_v61 = vld [vmem:[%s3872_s13 + $0x40] sm:$0xf]  ;;  %v457_v62 = vsel %vm3949_vm6, %v449_v42, %v456_v52  ;;  %v723_v63 = vsel %vm3956_vm7, %v458_v53, %v722_v46  ;;  %v473_v0 = vor.u32 %v471_v48, %v470_v55  ;;  %v475_v1 = vrot.slane %v470_v55, 4  ;;  %v339_v3 = vld [vmem:[%s3872_s13 + $0x44] sm:$0xf] }
  0x90   : > { %v732_v2 = vld [vmem:[#allocation2 + $0x60] sm:$0xf]  ;;  %721 = vst.msk [vmem:[#allocation2 + $0x4c] sm:$0xf] %vm266_vm0, %v457_v62  ;;  %724 = vst [vmem:[#allocation2 + $0x50] sm:$0x1] %v723_v63  ;;  %v726_v4 = vsel %vm3943_vm5, %v465_v57, %v725_v54  ;;  %v482_v5 = vor.u32 %v480_v50, %v479_v59 }
  0x91   : > { %v483_v6 = vrot.slane %v479_v59, 4  ;;  %v487_v7 = vrot.slane %v485_v60, 7  ;;  %v340_v8 = vld [vmem:[%s3872_s13 + $0x48] sm:$0xf]  ;;  %727 = vst [vmem:[#allocation2 + $0x54] sm:$0xf] %v726_v4  ;;  %v474_v9 = vsel %vm3949_vm6, %v466_v58, %v473_v0  ;;  %v730_v11 = vsel %vm3956_vm7, %v475_v1, %v729_v56 }
  0x92   : > { %v488_v12 = vshll.u32 %v337_v45, 16  ;;  %v736_v13 = vld [vmem:[#allocation2 + $0x68] sm:$0x1]  ;;  %v494_v14 = vshrl.u32 %v338_v61, 16  ;;  %v341_v15 = vld [vmem:[%s3872_s13 + $0x4c] sm:$0xf]  ;;  %v733_v16 = vsel %vm3943_vm5, %v482_v5, %v732_v2 }
  0x93   : > { %728 = vst.msk [vmem:[#allocation2 + $0x58] sm:$0xf] %vm266_vm0, %v474_v9  ;;  %731 = vst [vmem:[#allocation2 + $0x5c] sm:$0x1] %v730_v11  ;;  %v492_v18 = vrot.slane %v487_v7, 4  ;;  %v497_v19 = vshll.u32 %v338_v61, 16 }
  0x94   : > { %v502_v20 = vshrl.u32 %v339_v3, 16  ;;  %734 = vst [vmem:[#allocation2 + $0x60] sm:$0xf] %v733_v16  ;;  %v490_v21 = vor.u32 %v488_v12, %v487_v7  ;;  %v496_v22 = vrot.slane %v494_v14, 7  ;;  %v739_v23 = vld [vmem:[#allocation2 + $0x6c] sm:$0xf] }
  0x95   : > { %v505_v25 = vshll.u32 %v339_v3, 16  ;;  %v511_v26 = vshrl.u32 %v340_v8, 16  ;;  %v737_v27 = vsel %vm3956_vm7, %v492_v18, %v736_v13  ;;  %v514_v29 = vshll.u32 %v340_v8, 16  ;;  %v342_v31 = vld [vmem:[%s3872_s13 + $0x50] sm:$0xf] }
  0x96   : > { %v504_v28 = vrot.slane %v502_v20, 7  ;;  %v519_v30 = vshrl.u32 %v341_v15, 16  ;;  %v491_v32 = vsel %vm3949_vm6, %v483_v6, %v490_v21  ;;  %738 = vst [vmem:[#allocation2 + $0x68] sm:$0x1] %v737_v27  ;;  %v499_v33 = vor.u32 %v497_v19, %v496_v22  ;;  %v743_v35 = vld [vmem:[#allocation2 + $0x74] sm:$0x1] }
  0x97   : > { %v500_v34 = vrot.slane %v496_v22, 4  ;;  %v513_v36 = vrot.slane %v511_v26, 7  ;;  %v746_v37 = vld [vmem:[#allocation2 + $0x78] sm:$0xf]  ;;  %735 = vst.msk [vmem:[#allocation2 + $0x64] sm:$0xf] %vm266_vm0, %v491_v32 }
  0x98   : > { %v507_v38 = vor.u32 %v505_v25, %v504_v28  ;;  %v509_v39 = vrot.slane %v504_v28, 4  ;;  %v521_v40 = vrot.slane %v519_v30, 7  ;;  %v522_v41 = vshll.u32 %v341_v15, 16  ;;  %v343_v42 = vld [vmem:[%s3872_s13 + $0x54] sm:$0xf] }
  0x99   : > { %v740_v43 = vsel %vm3943_vm5, %v499_v33, %v739_v23  ;;  %v516_v44 = vor.u32 %v514_v29, %v513_v36  ;;  %v517_v45 = vrot.slane %v513_v36, 4  ;;  %v750_v46 = vld [vmem:[#allocation2 + $0x80] sm:$0x1]  ;;  %v528_v47 = vshrl.u32 %v342_v31, 16  ;;  %v344_v48 = vld [vmem:[%s3872_s13 + $0x58] sm:$0xf] }
  0x9a   : > { %741 = vst [vmem:[#allocation2 + $0x6c] sm:$0xf] %v740_v43  ;;  %v508_v49 = vsel %vm3949_vm6, %v500_v34, %v507_v38  ;;  %v744_v50 = vsel %vm3956_vm7, %v509_v39, %v743_v35  ;;  %v524_v51 = vor.u32 %v522_v41, %v521_v40  ;;  %v526_v52 = vrot.slane %v521_v40, 4  ;;  %v345_v53 = vld [vmem:[%s3872_s13 + $0x5c] sm:$0xf] }
  0x9b   : > { %742 = vst.msk [vmem:[#allocation2 + $0x70] sm:$0xf] %vm266_vm0, %v508_v49  ;;  %745 = vst [vmem:[#allocation2 + $0x74] sm:$0x1] %v744_v50  ;;  %v747_v54 = vsel %vm3943_vm5, %v516_v44, %v746_v37  ;;  %v530_v55 = vrot.slane %v528_v47, 7  ;;  %v531_v56 = vshll.u32 %v342_v31, 16 }
  0x9c   : > { %v536_v57 = vshrl.u32 %v343_v42, 16  ;;  %v346_v58 = vld [vmem:[%s3872_s13 + $0x60] sm:$0xf]  ;;  %748 = vst [vmem:[#allocation2 + $0x78] sm:$0xf] %v747_v54  ;;  %v525_v59 = vsel %vm3949_vm6, %v517_v45, %v524_v51  ;;  %v751_v60 = vsel %vm3956_vm7, %v526_v52, %v750_v46  ;;  %v539_v62 = vshll.u32 %v343_v42, 16 }
  0x9d   : > { %v753_v61 = vld [vmem:[#allocation2 + $0x84] sm:$0xf]  ;;  %v545_v63 = vshrl.u32 %v344_v48, 16  ;;  %749 = vst.msk [vmem:[#allocation2 + $0x7c] sm:$0xf] %vm266_vm0, %v525_v59  ;;  %v533_v0 = vor.u32 %v531_v56, %v530_v55  ;;  %v534_v1 = vrot.slane %v530_v55, 4 }
  0x9e   : > { %752 = vst [vmem:[#allocation2 + $0x80] sm:$0x1] %v751_v60  ;;  %v538_v2 = vrot.slane %v536_v57, 7  ;;  %v757_v3 = vld [vmem:[#allocation2 + $0x8c] sm:$0x1]  ;;  %v548_v4 = vshll.u32 %v344_v48, 16 }
  0x9f   : > { %v547_v5 = vrot.slane %v545_v63, 7  ;;  %v553_v6 = vshrl.u32 %v345_v53, 16  ;;  %v556_v7 = vshll.u32 %v345_v53, 16  ;;  %v562_v8 = vshrl.u32 %v346_v58, 16  ;;  %v347_v9 = vld [vmem:[%s3872_s13 + $0x64] sm:$0xf] }
  0xa0   : > { %v754_v11 = vsel %vm3943_vm5, %v533_v0, %v753_v61  ;;  %v541_v12 = vor.u32 %v539_v62, %v538_v2  ;;  %v543_v13 = vrot.slane %v538_v2, 4  ;;  %v760_v14 = vld [vmem:[#allocation2 + $0x90] sm:$0xf]  ;;  %v764_v15 = vld [vmem:[#allocation2 + $0x98] sm:$0x1]  ;;  %v565_v16 = vshll.u32 %v346_v58, 16 }
  0xa1   : > { %755 = vst [vmem:[#allocation2 + $0x84] sm:$0xf] %v754_v11  ;;  %v550_v18 = vor.u32 %v548_v4, %v547_v5  ;;  %v551_v19 = vrot.slane %v547_v5, 4  ;;  %v555_v20 = vrot.slane %v553_v6, 7  ;;  %v564_v21 = vrot.slane %v562_v8, 7 }
  0xa2   : > { %v348_v22 = vld [vmem:[%s3872_s13 + $0x68] sm:$0xf]  ;;  %v542_v23 = vsel %vm3949_vm6, %v534_v1, %v541_v12  ;;  %v758_v25 = vsel %vm3956_vm7, %v543_v13, %v757_v3  ;;  %v767_v26 = vld [vmem:[#allocation2 + $0x9c] sm:$0xf]  ;;  %v570_v27 = vshrl.u32 %v347_v9, 16  ;;  %v573_v28 = vshll.u32 %v347_v9, 16 }
  0xa3   : > { %v349_v29 = vld [vmem:[%s3872_s13 + $0x6c] sm:$0xf]  ;;  %756 = vst.msk [vmem:[#allocation2 + $0x88] sm:$0xf] %vm266_vm0, %v542_v23  ;;  %759 = vst [vmem:[#allocation2 + $0x8c] sm:$0x1] %v758_v25  ;;  %v761_v30 = vsel %vm3943_vm5, %v550_v18, %v760_v14  ;;  %v558_v31 = vor.u32 %v556_v7, %v555_v20  ;;  %v567_v33 = vor.u32 %v565_v16, %v564_v21 }
  0xa4   : > { %v560_v32 = vrot.slane %v555_v20, 4  ;;  %v350_v34 = vld [vmem:[%s3872_s13 + $0x70] sm:$0xf]  ;;  %762 = vst [vmem:[#allocation2 + $0x90] sm:$0xf] %v761_v30  ;;  %v568_v35 = vrot.slane %v564_v21, 4 }
  0xa5   : > { %v572_v36 = vrot.slane %v570_v27, 7  ;;  %v579_v37 = vshrl.u32 %v348_v22, 16  ;;  %v582_v38 = vshll.u32 %v348_v22, 16  ;;  %v351_v39 = vld [vmem:[%s3872_s13 + $0x74] sm:$0xf]  ;;  %v559_v40 = vsel %vm3949_vm6, %v551_v19, %v558_v31 }
  0xa6   : > { %v765_v41 = vsel %vm3956_vm7, %v560_v32, %v764_v15  ;;  %v768_v42 = vsel %vm3943_vm5, %v567_v33, %v767_v26  ;;  %v771_v43 = vld [vmem:[#allocation2 + $0xa4] sm:$0x1]  ;;  %v587_v44 = vshrl.u32 %v349_v29, 16  ;;  %763 = vst.msk [vmem:[#allocation2 + $0x94] sm:$0xf] %vm266_vm0, %v559_v40  ;;  %v590_v49 = vshll.u32 %v349_v29, 16 }
  0xa7   : > { %766 = vst [vmem:[#allocation2 + $0x98] sm:$0x1] %v765_v41  ;;  %769 = vst [vmem:[#allocation2 + $0x9c] sm:$0xf] %v768_v42  ;;  %v575_v45 = vor.u32 %v573_v28, %v572_v36  ;;  %v577_v46 = vrot.slane %v572_v36, 4  ;;  %v581_v47 = vrot.slane %v579_v37, 7 }
  0xa8   : > { %v774_v48 = vld [vmem:[#allocation2 + $0xa8] sm:$0xf]  ;;  %v589_v50 = vrot.slane %v587_v44, 7  ;;  %v596_v51 = vshrl.u32 %v350_v34, 16  ;;  %v599_v52 = vshll.u32 %v350_v34, 16  ;;  %v604_v53 = vshrl.u32 %v351_v39, 16 }
  0xa9   : > { %v352_v54 = vld [vmem:[%s3872_s13 + $0x78] sm:$0xf]  ;;  %v576_v55 = vsel %vm3949_vm6, %v568_v35, %v575_v45  ;;  %v772_v56 = vsel %vm3956_vm7, %v577_v46, %v771_v43  ;;  %v584_v57 = vor.u32 %v582_v38, %v581_v47  ;;  %v585_v58 = vrot.slane %v581_v47, 4  ;;  %v778_v59 = vld [vmem:[#allocation2 + $0xb0] sm:$0x1] }
  0xaa   : > { %770 = vst.msk [vmem:[#allocation2 + $0xa0] sm:$0xf] %vm266_vm0, %v576_v55  ;;  %773 = vst [vmem:[#allocation2 + $0xa4] sm:$0x1] %v772_v56  ;;  %v592_v60 = vor.u32 %v590_v49, %v589_v50  ;;  %v594_v61 = vrot.slane %v589_v50, 4  ;;  %v598_v62 = vrot.slane %v596_v51, 7 }
  0xab   : > { %v606_v63 = vrot.slane %v604_v53, 7  ;;  %v353_v0 = vld [vmem:[%s3872_s13 + $0x7c] sm:$0xf]  ;;  %v775_v1 = vsel %vm3943_vm5, %v584_v57, %v774_v48  ;;  %v781_v2 = vld [vmem:[#allocation2 + $0xb4] sm:$0xf]  ;;  %v607_v3 = vshll.u32 %v351_v39, 16 }
  0xac   : > { %v613_v4 = vshrl.u32 %v352_v54, 16  ;;  %v616_v5 = vshll.u32 %v352_v54, 16  ;;  %776 = vst [vmem:[#allocation2 + $0xa8] sm:$0xf] %v775_v1  ;;  %v593_v6 = vsel %vm3949_vm6, %v585_v58, %v592_v60  ;;  %v779_v7 = vsel %vm3956_vm7, %v594_v61, %v778_v59  ;;  %v785_v11 = vld [vmem:[#allocation2 + $0xbc] sm:$0x1] }
  0xad   : > { %v601_v8 = vor.u32 %v599_v52, %v598_v62  ;;  %v602_v9 = vrot.slane %v598_v62, 4  ;;  %777 = vst.msk [vmem:[#allocation2 + $0xac] sm:$0xf] %vm266_vm0, %v593_v6  ;;  %780 = vst [vmem:[#allocation2 + $0xb0] sm:$0x1] %v779_v7  ;;  %v609_v12 = vor.u32 %v607_v3, %v606_v63  ;;  %v611_v13 = vrot.slane %v606_v63, 4 }
  0xae   : > { %v615_v14 = vrot.slane %v613_v4, 7  ;;  %v621_v15 = vshrl.u32 %v353_v0, 16  ;;  %v788_v18 = vld [vmem:[#allocation2 + $0xc0] sm:$0xf]  ;;  %v624_v19 = vshll.u32 %v353_v0, 16 }
  0xaf   : > { %v782_v16 = vsel %vm3943_vm5, %v601_v8, %v781_v2  ;;  %v610_v20 = vsel %vm3949_vm6, %v602_v9, %v609_v12  ;;  %v786_v21 = vsel %vm3956_vm7, %v611_v13, %v785_v11  ;;  %v792_v27 = vld [vmem:[#allocation2 + $0xc8] sm:$0x1] }
  0xb0   : > { %783 = vst [vmem:[#allocation2 + $0xb4] sm:$0xf] %v782_v16  ;;  %v618_v22 = vor.u32 %v616_v5, %v615_v14  ;;  %784 = vst.msk [vmem:[#allocation2 + $0xb8] sm:$0xf] %vm266_vm0, %v610_v20  ;;  %v619_v23 = vrot.slane %v615_v14, 4  ;;  %v623_v25 = vrot.slane %v621_v15, 7 }
  0xb1   : > { %787 = vst [vmem:[#allocation2 + $0xbc] sm:$0x1] %v786_v21 }
  0xb2   : > { %v789_v26 = vsel %vm3943_vm5, %v618_v22, %v788_v18  ;;  %v626_v28 = vor.u32 %v624_v19, %v623_v25  ;;  %v628_v29 = vrot.slane %v623_v25, 4 }
  0xb3   : > { %790 = vst [vmem:[#allocation2 + $0xc0] sm:$0xf] %v789_v26 }
  0xb4   : > { %v627_v30 = vsel %vm3949_vm6, %v619_v23, %v626_v28  ;;  %v793_v31 = vsel %vm3956_vm7, %v628_v29, %v792_v27 }
  0xb5   : > { %791 = vst.msk [vmem:[#allocation2 + $0xc4] sm:$0xf] %vm266_vm0, %v627_v30  ;;  %794 = vst [vmem:[#allocation2 + $0xc8] sm:$0x1] %v793_v31 }
  0xb6 PF: > { %s3277_s16 = smul.u32 96, %s3685_s15  ;;  %vm1196_vm8 = vcmask 1042432   ;;  %vm1197_vm9 = vcmask 1046532   ;;  %v3544_v32 = vld [vmem:[#allocation4 + $0x40] sm:$0xff]   ;;  %vm896_vm11 = vsmask.f32 3328 }
  0xb7   : > { %vm4099_vm10 = vmor %vm1196_vm8, %vm1197_vm9  ;;  %vm897_vm12 = vsmask.f32 7440  ;;  %3341 = vmatprep.subr.bf16.mxu0 %v3544_v32  ;;  %3435 = vmatprep.subr.bf16.mxu1 %v3544_v32  ;;  %s3709_s15 = smov 64   ;;  %s3710_s6 = smov 96   ;;  %vm863_vm14 = vcmask 261120   ;;  %vm1139_vm15 = vcmask 523520  }
  0xb8   : > { %s4103_s5 = scalar_lea.vmem [#allocation2], %s3277_s16  ;;  %s3711_s21 = smov 32   ;;  %vm4135_vm13 = vmor %vm896_vm11, %vm897_vm12  ;;  %vm1303_vm0 = vcmask 785920   ;;  %vm1396_vm1 = vcmask 1048320   ;;  %v3570_v10 = vld [vmem:[#allocation4 + $0x80] sm:$0xff]  }
  0xbc   : > { %v3092_v17 = vld [vmem:[%s4103_s5 + $0xc] sm:$0xe]  ;;  %v3093_v24 = vld [vmem:[%s4103_s5 + $0x10] sm:$0xf]  ;;  %v3094_v33 = vld [vmem:[%s4103_s5 + $0x14] sm:$0x1] }
  0xbd   : > { %v3116_v34 = vrot.slane %v3092_v17, 9  ;;  %v1711_v35 = vrot.slane %v3093_v24, 5  ;;  %v1714_v36 = vrot.slane %v3094_v33, 5  ;;  %v3528_v37 = vld [vmem:[%s4103_s5 + $0x18] sm:$0xff]   ;;  %v3110_v38 = vld [vmem:[%s4103_s5 + $0x54] sm:$0xe] }
  0xbe   : > { %v3111_v39 = vld [vmem:[%s4103_s5 + $0x58] sm:$0xf]  ;;  %1881 = vrot.lane.b32.xlu1 %v3528_v37, %s3709_s15  ;;  %v3112_v42 = vld [vmem:[%s4103_s5 + $0x5c] sm:$0x1]  ;;  %v3122_v43 = vrot.slane %v3110_v38, 9  ;;  %v3529_v45 = vld [vmem:[%s4103_s5 + $0xc] sm:$0xff]  }
  0xbf   : > { %v1712_v40 = vsel %vm4099_vm10, %v3116_v34, %v1711_v35  ;;  %v1713_v41 = vrot.slane %v1711_v35, 4  ;;  %v1753_v44 = vrot.slane %v3111_v39, 5  ;;  %v1756_v46 = vrot.slane %v3112_v42, 5  ;;  %v872_v50 = vld [vmem:[%s4103_s5] sm:$0xf] }
  0xc0   : > { %v873_v51 = vld [vmem:[%s4103_s5 + $0x4] sm:$0xf]  ;;  %v874_v53 = vld [vmem:[%s4103_s5 + $0x8] sm:$0x1]  ;;  %v900_v54 = vshrl.u32 %v872_v50, 16  ;;  %v903_v55 = vshll.u32 %v872_v50, 16 }
  0xc1   : > { %v1715_v47 = vsel %vm4099_vm10, %v1713_v41, %v1714_v36  ;;  %v1754_v48 = vsel %vm4099_vm10, %v3122_v43, %v1753_v44  ;;  %v1755_v49 = vrot.slane %v1753_v44, 4  ;;  %v909_v56 = vshll.u32 %v873_v51, 16  ;;  %v1148_v60 = vld [vmem:[%s4103_s5] sm:$0xe]  ;;  %v1149_v61 = vld [vmem:[%s4103_s5 + $0x4] sm:$0xf] }
  0xc2   : > { %v3124_v52 = vcombine.low %v1712_v40, %v1715_v47  ;;  %1372 = vrot.lane.b32.xlu1 %v3529_v45, %s3710_s6  ;;  %v913_v58 = vshrl.u32 %v873_v51, 16  ;;  %v919_v59 = vshll.u32 %v874_v53, 16  ;;  %v902_v63 = vrot.slane %v900_v54, 4  ;;  %v1150_v2 = vld [vmem:[%s4103_s5 + $0x8] sm:$0x1] }
  0xc3   : > { %v1757_v57 = vsel %vm4099_vm10, %v1755_v49, %v1756_v46  ;;  %v905_v0 = vrot.slane %v903_v55, 5  ;;  %v911_v1 = vrot.slane %v909_v56, 5  ;;  %v3018_v5 = vrot.slane %v1148_v60, 9  ;;  %v3158_v7 = vld [vmem:[%s4103_s5 + $0x18] sm:$0xf] }
  0xc4   : > { %1789 = vrot.lane.b32.xlu0 %v3124_v52, %s3711_s21  ;;  %v3130_v62 = vcombine.low %v1754_v48, %v1757_v57  ;;  %v915_v3 = vrot.slane %v913_v58, 4  ;;  %v921_v4 = vrot.slane %v919_v59, 5  ;;  %v1201_v6 = vrot.slane %v1149_v61, 5  ;;  %v3159_v11 = vld [vmem:[%s4103_s5 + $0x1c] sm:$0xf] }
  0xc5   : > { %v906_v8 = vor.u32 %v905_v0, %v902_v63  ;;  %v1204_v9 = vrot.slane %v1150_v2, 5  ;;  %v3160_v12 = vld [vmem:[%s4103_s5 + $0x20] sm:$0x1]  ;;  %v1938_v13 = vshrl.u32 %v3158_v7, 16  ;;  %v1941_v19 = vshll.u32 %v3158_v7, 16 }
  0xc6   : > { %v916_v15 = vor.u32 %v915_v3, %v911_v1  ;;  %v1202_v16 = vsel %vm4099_vm10, %v3018_v5, %v1201_v6  ;;  %v1203_v18 = vrot.slane %v1201_v6, 4  ;;  %v890_v20 = vld [vmem:[%s4103_s5 + $0x48] sm:$0xf]  ;;  %v1947_v23 = vshll.u32 %v3159_v11, 16  ;;  %v891_v26 = vld [vmem:[%s4103_s5 + $0x4c] sm:$0xf] }
  0xc7   : > { %v907_v21 = vrot.slane %v906_v8, 4  ;;  %v1940_v22 = vrot.slane %v1938_v13, 4  ;;  %v1951_v25 = vshrl.u32 %v3159_v11, 16  ;;  %v1943_v29 = vrot.slane %v1941_v19, 5  ;;  %v892_v33 = vld [vmem:[%s4103_s5 + $0x50] sm:$0x1] }
  0xc8   : > { %1801 = vrot.lane.b32.xlu0 %v3130_v62, %s3711_s21  ;;  %v917_v27 = vrot.slane %v916_v15, 4  ;;  %v1205_v28 = vsel %vm4099_vm10, %v1203_v18, %v1204_v9  ;;  %v1957_v30 = vshll.u32 %v3160_v12, 16  ;;  %v1949_v17 = vrot.slane %v1947_v23, 5  ;;  %v1166_v38 = vld [vmem:[%s4103_s5 + $0x48] sm:$0xe]  ;;  %v3530_v13 = vld [vmem:[%s4103_s5 + $0x60] sm:$0xff]  }
  0xc9   : > { %v912_v31 = vsel %vm4135_vm13, %v907_v21, %v911_v1  ;;  %v3026_v32 = vcombine.low %v1202_v16, %v1205_v28  ;;  %v1953_v24 = vrot.slane %v1951_v25, 4  ;;  %v1944_v35 = vor.u32 %v1943_v29, %v1940_v22  ;;  %v1167_v39 = vld [vmem:[%s4103_s5 + $0x4c] sm:$0xf]  ;;  %v1168_v44 = vld [vmem:[%s4103_s5 + $0x50] sm:$0x1] }
  0xca   : > { %v922_v34 = vsel %vm4135_vm13, %v917_v27, %v921_v4  ;;  %v1959_v36 = vrot.slane %v1957_v30, 5  ;;  %v1044_v37 = vshrl.u32 %v890_v20, 16  ;;  %v1047_v42 = vshll.u32 %v890_v20, 16  ;;  %v3176_v45 = vld [vmem:[%s4103_s5 + $0x60] sm:$0xf] }
  0xcb   : > { %v3010_v40 = vcombine.low %v912_v31, %v922_v34  ;;  %1279 = vrot.lane.b32.xlu1 %v3026_v32, %s3709_s15  ;;  %v1954_v41 = vor.u32 %v1953_v24, %v1949_v17  ;;  %v1053_v43 = vshll.u32 %v891_v26, 16  ;;  %v1945_v46 = vrot.slane %v1944_v35, 4  ;;  %v3177_v50 = vld [vmem:[%s4103_s5 + $0x64] sm:$0xf]  ;;  %v3178_v61 = vld [vmem:[%s4103_s5 + $0x68] sm:$0x1] }
  0xcc   : > { %v1046_v47 = vrot.slane %v1044_v37, 4  ;;  %v1057_v48 = vshrl.u32 %v891_v26, 16  ;;  %v1063_v49 = vshll.u32 %v892_v33, 16  ;;  %v1049_v52 = vrot.slane %v1047_v42, 5  ;;  %v3095_v63 = vld [vmem:[%s4103_s5 + $0x18] sm:$0xe] }
  0xcd   : > { %1115 = vrot.lane.b32.xlu0 %v3010_v40, %s3711_s21  ;;  %v1955_v51 = vrot.slane %v1954_v41, 4  ;;  %v1055_v53 = vrot.slane %v1053_v43, 5  ;;  %v1950_v54 = vsel %vm4135_vm13, %v1945_v46, %v1949_v17  ;;  %v3024_v56 = vrot.slane %v1166_v38, 9  ;;  %v3096_v4 = vld [vmem:[%s4103_s5 + $0x1c] sm:$0xf] }
  0xce   : > { %v1059_v55 = vrot.slane %v1057_v48, 4  ;;  %v1243_v57 = vrot.slane %v1167_v39, 5  ;;  %v1050_v59 = vor.u32 %v1049_v52, %v1046_v47  ;;  %v1246_v60 = vrot.slane %v1168_v44, 5  ;;  %v3097_v5 = vld [vmem:[%s4103_s5 + $0x20] sm:$0x1] }
  0xcf   : > { %v1960_v58 = vsel %vm4135_vm13, %v1955_v51, %v1959_v36  ;;  %v2082_v62 = vshrl.u32 %v3176_v45, 16  ;;  %v1065_v2 = vrot.slane %v1063_v49, 5  ;;  %v2085_v8 = vshll.u32 %v3176_v45, 16  ;;  %v875_v11 = vld [vmem:[%s4103_s5 + $0xc] sm:$0xf] }
  0xd0   : > { %v3182_v0 = vcombine.low %v1950_v54, %v1960_v58  ;;  %v1060_v1 = vor.u32 %v1059_v55, %v1055_v53  ;;  %v1245_v3 = vrot.slane %v1243_v57, 4  ;;  %v1051_v6 = vrot.slane %v1050_v59, 4  ;;  %v876_v19 = vld [vmem:[%s4103_s5 + $0x10] sm:$0xf]  ;;  %v877_v17 = vld [vmem:[%s4103_s5 + $0x14] sm:$0x1] }
  0xd1   : > { %v2084_v7 = vrot.slane %v2082_v62, 4  ;;  %v2091_v9 = vshll.u32 %v3177_v50, 16  ;;  %v1244_v15 = vsel %vm4099_vm10, %v3024_v56, %v1243_v57  ;;  %v2095_v16 = vshrl.u32 %v3177_v50, 16  ;;  %v1151_v24 = vld [vmem:[%s4103_s5 + $0xc] sm:$0xe]  ;;  %v3531_v58 = vld [vmem:[%s4103_s5 + $0x54] sm:$0xff]  }
  0xd2   : > { %2153 = vrot.lane.b32.xlu0 %v3182_v0, %s3710_s6  ;;  %v1061_v12 = vrot.slane %v1060_v1, 4  ;;  %v2101_v18 = vshll.u32 %v3178_v61, 16  ;;  %v1056_v20 = vsel %vm4135_vm13, %v1051_v6, %v1055_v53  ;;  %v1247_v21 = vsel %vm4099_vm10, %v1245_v3, %v1246_v60  ;;  %v1152_v37 = vld [vmem:[%s4103_s5 + $0x10] sm:$0xf]  ;;  %v1153_v42 = vld [vmem:[%s4103_s5 + $0x14] sm:$0x1] }
  0xd3   : > { %v2087_v22 = vrot.slane %v2085_v8, 5  ;;  %v2093_v23 = vrot.slane %v2091_v9, 5  ;;  %v2097_v26 = vrot.slane %v2095_v16, 4  ;;  %v3117_v28 = vrot.slane %v3095_v63, 9  ;;  %v3161_v47 = vld [vmem:[%s4103_s5 + $0x24] sm:$0xf] }
  0xd4   : > { %v1066_v25 = vsel %vm4135_vm13, %v1061_v12, %v1065_v2  ;;  %v2103_v27 = vrot.slane %v2101_v18, 5  ;;  %v1718_v31 = vrot.slane %v3096_v4, 5  ;;  %v1721_v32 = vrot.slane %v3097_v5, 5  ;;  %v3162_v56 = vld [vmem:[%s4103_s5 + $0x28] sm:$0xf] }
  0xd5   : > { %v3016_v29 = vcombine.low %v1056_v20, %v1066_v25  ;;  %v2088_v30 = vor.u32 %v2087_v22, %v2084_v7  ;;  %v2098_v33 = vor.u32 %v2097_v26, %v2093_v23  ;;  %v924_v34 = vshrl.u32 %v875_v11, 16  ;;  %v3163_v62 = vld [vmem:[%s4103_s5 + $0x2c] sm:$0x1]  ;;  %v3113_v3 = vld [vmem:[%s4103_s5 + $0x60] sm:$0xe]  ;;  %v3532_v18 = vld [vmem:[%s4103_s5 + $0x24] sm:$0xff]  }
  0xd6   : > { %1893 = vrot.lane.b32.xlu0 %v3530_v13, %s3709_s15  ;;  %v927_v35 = vshll.u32 %v875_v11, 16  ;;  %v933_v36 = vshll.u32 %v876_v19, 16  ;;  %v3032_v38 = vcombine.low %v1244_v15, %v1247_v21  ;;  %v1720_v40 = vrot.slane %v1718_v31, 4  ;;  %v3114_v4 = vld [vmem:[%s4103_s5 + $0x64] sm:$0xf] }
  0xd7   : > { %1127 = vrot.lane.b32.xlu1 %v3016_v29, %s3711_s21  ;;  %v2089_v39 = vrot.slane %v2088_v30, 4  ;;  %v937_v41 = vshrl.u32 %v876_v19, 16  ;;  %v2099_v43 = vrot.slane %v2098_v33, 4  ;;  %v926_v44 = vrot.slane %v924_v34, 4  ;;  %v3115_v9 = vld [vmem:[%s4103_s5 + $0x68] sm:$0x1] }
  0xd8   : > { %v929_v45 = vrot.slane %v927_v35, 5  ;;  %v935_v46 = vrot.slane %v933_v36, 5  ;;  %v1719_v49 = vsel %vm4099_vm10, %v3117_v28, %v1718_v31  ;;  %v943_v51 = vshll.u32 %v877_v17, 16  ;;  %v893_v22 = vld [vmem:[%s4103_s5 + $0x54] sm:$0xf]  ;;  %v3545_v30 = vld [vmem:[#allocation4] sm:$0xff]  }
  0xd9   : > { %v2094_v48 = vsel %vm4135_vm13, %v2089_v39, %v2093_v23  ;;  %v939_v50 = vrot.slane %v937_v41, 4  ;;  %v2104_v52 = vsel %vm4135_vm13, %v2099_v43, %v2103_v27  ;;  %v1722_v53 = vsel %vm4099_vm10, %v1720_v40, %v1721_v32  ;;  %v894_v28 = vld [vmem:[%s4103_s5 + $0x58] sm:$0xf]  ;;  %v895_v29 = vld [vmem:[%s4103_s5 + $0x5c] sm:$0x1]  ;;  %3342 = vmatpush3.bf16.msra.mxu0 %v3545_v30  ;;  %v3546_v39 = vld [vmem:[#allocation4 + $0x48] sm:$0xff]   ;;  %3443 = vmatpush3.bf16.msra.mxu1 %v3545_v30 }
  0xda   : > { %v930_v54 = vor.u32 %v929_v45, %v926_v44  ;;  %v3019_v55 = vrot.slane %v1151_v24, 9  ;;  %v3188_v57 = vcombine.low %v2094_v48, %v2104_v52  ;;  %v945_v60 = vrot.slane %v943_v51, 5  ;;  %v4216_v33 = vld [vmem:[%s4103_s5 + $0x54] sm:$0xe]  ;;  %v4223_v44 = vld [vmem:[%s4103_s5 + $0x5c] sm:$0x1]  ;;  %3343 = vmatprep.subr.bf16.mxu0 %v3546_v39  ;;  %3436 = vmatprep.subr.bf16.mxu1 %v3546_v39 }
  0xdb   : > { %1291 = vrot.lane.b32.xlu1 %v3032_v38, %s3709_s15  ;;  %v940_v59 = vor.u32 %v939_v50, %v935_v46  ;;  %v1208_v61 = vrot.slane %v1152_v37, 5  ;;  %v1211_v0 = vrot.slane %v1153_v42, 5  ;;  %v1962_v1 = vshrl.u32 %v3161_v47, 16  ;;  %v4219_v38 = vld [vmem:[%s4103_s5 + $0x58] sm:$0xf]  ;;  %v3548_v51 = vld [vmem:[#allocation4 + $0x50] sm:$0xff]  }
  0xdc   : > { %v931_v63 = vrot.slane %v930_v54, 4  ;;  %v1965_v2 = vshll.u32 %v3161_v47, 16  ;;  %2165 = vrot.lane.b32.xlu0 %v3188_v57, %s3710_s6  ;;  %v3125_v5 = vcombine.low %v1719_v49, %v1722_v53  ;;  %v1971_v8 = vshll.u32 %v3162_v56, 16  ;;  %v3179_v45 = vld [vmem:[%s4103_s5 + $0x6c] sm:$0xf]  ;;  %v3552_v30 = vld [vmem:[#allocation4 + $0x60] sm:$0xff]  }
  0xdd   : > { %v941_v6 = vrot.slane %v940_v59, 4  ;;  %v1210_v7 = vrot.slane %v1208_v61, 4  ;;  %v1964_v12 = vrot.slane %v1962_v1, 4  ;;  %v1975_v15 = vshrl.u32 %v3162_v56, 16 }
  0xde   : > { %v936_v11 = vsel %vm4135_vm13, %v931_v63, %v935_v46  ;;  %v1967_v13 = vrot.slane %v1965_v2, 5  ;;  %v1209_v19 = vsel %vm4099_vm10, %v3019_v55, %v1208_v61  ;;  %v1973_v20 = vrot.slane %v1971_v8, 5  ;;  %v3547_v46 = vld [vmem:[#allocation4 + $0x8] sm:$0xff]   ;;  %v3549_v61 = vld [vmem:[#allocation4 + $0x10] sm:$0xff]   ;;  %v3533_v63 = vld [vmem:[%s4103_s5 + $0x18] sm:$0xff]  }
  0xdf   : > { %1384 = vrot.lane.b32.xlu1 %v3531_v58, %s3710_s6  ;;  %v946_v16 = vsel %vm4135_vm13, %v941_v6, %v945_v60  ;;  %v1981_v21 = vshll.u32 %v3163_v62, 16  ;;  %v1212_v25 = vsel %vm4099_vm10, %v1210_v7, %v1211_v0  ;;  %v1977_v27 = vrot.slane %v1975_v15, 4  ;;  %v3180_v60 = vld [vmem:[%s4103_s5 + $0x70] sm:$0xf]  ;;  %3344 = vmatpush3.bf16.msra.mxu0 %v3547_v46 }
  0xe0   : > { %v3011_v23 = vcombine.low %v936_v11, %v946_v16  ;;  %v1968_v26 = vor.u32 %v1967_v13, %v1964_v12  ;;  %1791 = vrot.lane.b32.xlu0 %v3125_v5, %s3711_s21  ;;  %v3123_v32 = vrot.slane %v3113_v3, 9  ;;  %v1760_v17 = vrot.slane %v3114_v4, 5  ;;  %3444 = vmatpush3.bf16.msra.mxu1 %v3547_v46  ;;  %v3181_v3 = vld [vmem:[%s4103_s5 + $0x74] sm:$0x1]  ;;  %v4246_v11 = vld [vmem:[%s4103_s5 + $0x28] sm:$0xf] }
  0xe1   : > { %v1983_v31 = vrot.slane %v1981_v21, 5  ;;  %v1763_v24 = vrot.slane %v3115_v9, 5  ;;  %v1978_v35 = vor.u32 %v1977_v27, %v1973_v20  ;;  %v1068_v36 = vshrl.u32 %v893_v22, 16  ;;  %3345 = vmatprep.subr.bf16.mxu0 %v3548_v51  ;;  %v3550_v4 = vld [vmem:[#allocation4 + $0x58] sm:$0xff]   ;;  %v4243_v9 = vld [vmem:[%s4103_s5 + $0x24] sm:$0xe]  ;;  %3437 = vmatprep.subr.bf16.mxu1 %v3548_v51 }
  0xe2   : > { %v1969_v34 = vrot.slane %v1968_v26, 4  ;;  %v1071_v37 = vshll.u32 %v893_v22, 16  ;;  %v3027_v40 = vcombine.low %v1209_v19, %v1212_v25  ;;  %v1762_v41 = vrot.slane %v1760_v17, 4  ;;  %v4249_v12 = vld [vmem:[%s4103_s5 + $0x2c] sm:$0x1]  ;;  %v3551_v25 = vld [vmem:[#allocation4 + $0x18] sm:$0xff]  }
  0xe3   : > { %1117 = vrot.lane.b32.xlu1 %v3011_v23, %s3711_s21  ;;  %v1077_v42 = vshll.u32 %v894_v28, 16  ;;  %v1081_v43 = vshrl.u32 %v894_v28, 16  ;;  %v1979_v48 = vrot.slane %v1978_v35, 4  ;;  %v1070_v49 = vrot.slane %v1068_v36, 4  ;;  %v878_v19 = vld [vmem:[%s4103_s5 + $0x18] sm:$0xf]  ;;  %3346 = vmatpush3.bf16.msra.mxu0 %v3549_v61 }
  0xe4   : > { %v1974_v47 = vsel %vm4135_vm13, %v1969_v34, %v1973_v20  ;;  %v1073_v50 = vrot.slane %v1071_v37, 5  ;;  %1883 = vrot.lane.b32.xlu0 %v3532_v18, %s3709_s15  ;;  %v1761_v52 = vsel %vm4099_vm10, %v3123_v32, %v1760_v17  ;;  %v1087_v55 = vshll.u32 %v895_v29, 16  ;;  %3445 = vmatpush3.bf16.msra.mxu1 %v3549_v61  ;;  %v3534_v32 = vld [vmem:[%s4103_s5 + $0x6c] sm:$0xff]   ;;  %v879_v34 = vld [vmem:[%s4103_s5 + $0x1c] sm:$0xf] }
  0xe5   : > { %v1079_v53 = vrot.slane %v1077_v42, 5  ;;  %v1083_v54 = vrot.slane %v1081_v43, 4  ;;  %v1984_v56 = vsel %vm4135_vm13, %v1979_v48, %v1983_v31  ;;  %v1764_v57 = vsel %vm4099_vm10, %v1762_v41, %v1763_v24  ;;  %3347 = vmatprep.subr.bf16.mxu0 %v3550_v4  ;;  %v880_v35 = vld [vmem:[%s4103_s5 + $0x20] sm:$0x1]  ;;  %3438 = vmatprep.subr.bf16.mxu1 %v3550_v4  ;;  %v3553_v46 = vld [vmem:[#allocation4 + $0x20] sm:$0xff]  }
  0xe6   : > { %v1074_v58 = vor.u32 %v1073_v50, %v1070_v49  ;;  %v3025_v59 = vrot.slane %v4216_v33, 9  ;;  %v3183_v62 = vcombine.low %v1974_v47, %v1984_v56  ;;  %v1089_v1 = vrot.slane %v1087_v55, 5  ;;  %v3554_v47 = vld [vmem:[%s4103_s5] sm:$0xff]   ;;  %v3165_v4 = vld [vmem:[%s4103_s5 + $0x34] sm:$0xf] }
  0xe7   : > { %1281 = vrot.lane.b32.xlu1 %v3027_v40, %s3709_s15  ;;  %v1084_v0 = vor.u32 %v1083_v54, %v1079_v53  ;;  %v1250_v2 = vrot.slane %v4219_v38, 5  ;;  %v1253_v6 = vrot.slane %v4223_v44, 5  ;;  %v2106_v7 = vshrl.u32 %v3179_v45, 16  ;;  %v4270_v40 = vld [vmem:[%s4103_s5 + $0x18] sm:$0xe]  ;;  %3348 = vmatpush3.bf16.msra.mxu0 %v3551_v25  ;;  %v3555_v54 = vld [vmem:[#allocation4 + $0x68] sm:$0xff]  }
  0xe8   : > { %v1075_v5 = vrot.slane %v1074_v58, 4  ;;  %v2109_v8 = vshll.u32 %v3179_v45, 16  ;;  %2155 = vrot.lane.b32.xlu0 %v3183_v62, %s3710_s6  ;;  %v3131_v13 = vcombine.low %v1761_v52, %v1764_v57  ;;  %v2115_v18 = vshll.u32 %v3180_v60, 16  ;;  %v4273_v45 = vld [vmem:[%s4103_s5 + $0x1c] sm:$0xf]  ;;  %3446 = vmatpush3.bf16.msra.mxu1 %v3551_v25  ;;  %864 = vst.msk [vmem:[#allocation3] sm:$0xff] %vm863_vm14, %v3554_v47 }
  0xe9   : > { %v1085_v15 = vrot.slane %v1084_v0, 4  ;;  %v1252_v16 = vrot.slane %v1250_v2, 4  ;;  %v2108_v21 = vrot.slane %v2106_v7, 4  ;;  %v2119_v23 = vshrl.u32 %v3180_v60, 16  ;;  %v4278_v52 = vld [vmem:[%s4103_s5 + $0x20] sm:$0x1]  ;;  %3349 = vmatprep.subr.bf16.mxu0 %v3552_v30  ;;  %3439 = vmatprep.subr.bf16.mxu1 %v3552_v30 }
  0xea   : > { %v1080_v20 = vsel %vm4135_vm13, %v1075_v5, %v1079_v53  ;;  %v2111_v22 = vrot.slane %v2109_v8, 5  ;;  %v1251_v27 = vsel %vm4099_vm10, %v3025_v59, %v1250_v2  ;;  %v2117_v28 = vrot.slane %v2115_v18, 5  ;;  %v3164_v53 = vld [vmem:[%s4103_s5 + $0x30] sm:$0xf]  ;;  %v3556_v5 = vld [vmem:[#allocation4 + $0x28] sm:$0xff]  }
  0xeb   : > { %1374 = vrot.lane.b32.xlu1 %v3533_v63, %s3710_s6  ;;  %v1090_v26 = vsel %vm4135_vm13, %v1085_v15, %v1089_v1  ;;  %v2125_v29 = vshll.u32 %v3181_v3, 16  ;;  %v1254_v17 = vsel %vm4099_vm10, %v1252_v16, %v1253_v6  ;;  %v2121_v33 = vrot.slane %v2119_v23, 4  ;;  %v3557_v63 = vld [vmem:[%s4103_s5 + $0x48] sm:$0xff]   ;;  %3350 = vmatpush3.bf16.msra.mxu0 %v3553_v46  ;;  %v3535_v7 = vld [vmem:[%s4103_s5 + $0x60] sm:$0xff]  }
  0xec   : > { %v3017_v31 = vcombine.low %v1080_v20, %v1090_v26  ;;  %v2112_v24 = vor.u32 %v2111_v22, %v2108_v21  ;;  %1803 = vrot.lane.b32.xlu0 %v3131_v13, %s3711_s21  ;;  %v3118_v37 = vrot.slane %v4243_v9, 9  ;;  %v1725_v38 = vrot.slane %v4246_v11, 5  ;;  %3447 = vmatpush3.bf16.msra.mxu1 %v3553_v46  ;;  %870 = vst.msk [vmem:[#allocation3 + $0x90] sm:$0xff] %vm863_vm14, %v3557_v63  ;;  %v3558_v13 = vld [vmem:[#allocation4 + $0x70] sm:$0xff]   ;;  %v4301_v20 = vld [vmem:[%s4103_s5 + $0x30] sm:$0xe] }
  0xed   : > { %v2127_v36 = vrot.slane %v2125_v29, 5  ;;  %v1728_v39 = vrot.slane %v4249_v12, 5  ;;  %v2122_v42 = vor.u32 %v2121_v33, %v2117_v28  ;;  %v948_v43 = vshrl.u32 %v878_v19, 16  ;;  %v3166_v12 = vld [vmem:[%s4103_s5 + $0x38] sm:$0x1]  ;;  %3351 = vmatprep.subr.bf16.mxu0 %v3555_v54  ;;  %3440 = vmatprep.subr.bf16.mxu1 %v3555_v54  ;;  %v3561_v54 = vld [vmem:[#allocation4 + $0x38] sm:$0xff]  }
  0xee   : > { %v2113_v41 = vrot.slane %v2112_v24, 4  ;;  %v951_v44 = vshll.u32 %v878_v19, 16  ;;  %v3033_v48 = vcombine.low %v1251_v27, %v1254_v17  ;;  %v1727_v49 = vrot.slane %v1725_v38, 4  ;;  %v4304_v21 = vld [vmem:[%s4103_s5 + $0x34] sm:$0xf]  ;;  %v3559_v17 = vld [vmem:[#allocation4 + $0x30] sm:$0xff]  }
  0xef   : > { %1129 = vrot.lane.b32.xlu1 %v3017_v31, %s3711_s21  ;;  %v957_v50 = vshll.u32 %v879_v34, 16  ;;  %v961_v51 = vshrl.u32 %v879_v34, 16  ;;  %v2123_v56 = vrot.slane %v2122_v42, 4  ;;  %v950_v57 = vrot.slane %v948_v43, 4  ;;  %v4307_v22 = vld [vmem:[%s4103_s5 + $0x38] sm:$0x1]  ;;  %3352 = vmatpush3.bf16.msra.mxu0 %v3556_v5 }
  0xf0   : > { %v2118_v55 = vsel %vm4135_vm13, %v2113_v41, %v2117_v28  ;;  %v953_v58 = vrot.slane %v951_v44, 5  ;;  %1895 = vrot.lane.b32.xlu0 %v3534_v32, %s3709_s15  ;;  %v1726_v59 = vsel %vm4099_vm10, %v3118_v37, %v1725_v38  ;;  %v967_v62 = vshll.u32 %v880_v35, 16  ;;  %v881_v28 = vld [vmem:[%s4103_s5 + $0x24] sm:$0xf]  ;;  %3448 = vmatpush3.bf16.msra.mxu1 %v3556_v5  ;;  %v3536_v38 = vld [vmem:[%s4103_s5 + $0x30] sm:$0xff]  }
  0xf1   : > { %v959_v60 = vrot.slane %v957_v50, 5  ;;  %v963_v61 = vrot.slane %v961_v51, 4  ;;  %v2128_v0 = vsel %vm4135_vm13, %v2123_v56, %v2127_v36  ;;  %v1729_v1 = vsel %vm4099_vm10, %v1727_v49, %v1728_v39  ;;  %3353 = vmatprep.subr.bf16.mxu0 %v3558_v13  ;;  %v3560_v36 = vld [vmem:[#allocation4 + $0x78] sm:$0xff]   ;;  %v882_v42 = vld [vmem:[%s4103_s5 + $0x28] sm:$0xf]  ;;  %3441 = vmatprep.subr.bf16.mxu1 %v3558_v13 }
  0xf2   : > { %v954_v2 = vor.u32 %v953_v58, %v950_v57  ;;  %v3020_v3 = vrot.slane %v4270_v40, 9  ;;  %v3189_v6 = vcombine.low %v2118_v55, %v2128_v0  ;;  %v969_v9 = vrot.slane %v967_v62, 5  ;;  %v883_v43 = vld [vmem:[%s4103_s5 + $0x2c] sm:$0x1]  ;;  %v3563_v62 = vld [vmem:[%s4103_s5 + $0x54] sm:$0xff]  }
  0xf3   : > { %1293 = vrot.lane.b32.xlu1 %v3033_v48, %s3709_s15  ;;  %v964_v8 = vor.u32 %v963_v61, %v959_v60  ;;  %v1215_v11 = vrot.slane %v4273_v45, 5  ;;  %v1218_v16 = vrot.slane %v4278_v52, 5  ;;  %v1986_v18 = vshrl.u32 %v3164_v53, 16  ;;  %v4328_v48 = vld [vmem:[%s4103_s5 + $0x24] sm:$0xe]  ;;  %3354 = vmatpush3.bf16.msra.mxu0 %v3559_v17  ;;  %v3562_v55 = vld [vmem:[%s4103_s5 + $0xc] sm:$0xff]  }
  0xf4   : > { %v955_v15 = vrot.slane %v954_v2, 4  ;;  %v1989_v19 = vshll.u32 %v3164_v53, 16  ;;  %2167 = vrot.lane.b32.xlu0 %v3189_v6, %s3710_s6  ;;  %v3126_v23 = vcombine.low %v1726_v59, %v1729_v1  ;;  %v1995_v27 = vshll.u32 %v3165_v4, 16  ;;  %v4331_v53 = vld [vmem:[%s4103_s5 + $0x28] sm:$0xf]  ;;  %3449 = vmatpush3.bf16.msra.mxu1 %v3559_v17  ;;  %865 = vst.msk [vmem:[#allocation3 + $0x18] sm:$0xff] %vm863_vm14, %v3562_v55 }
  0xf5   : > { %v965_v25 = vrot.slane %v964_v8, 4  ;;  %v1217_v26 = vrot.slane %v1215_v11, 4  ;;  %v1988_v30 = vrot.slane %v1986_v18, 4  ;;  %v1999_v32 = vshrl.u32 %v3165_v4, 16  ;;  %v3167_v61 = vld [vmem:[%s4103_s5 + $0x3c] sm:$0xf]  ;;  %3355 = vmatprep.subr.bf16.mxu0 %v3560_v36  ;;  %3442 = vmatprep.subr.bf16.mxu1 %v3560_v36 }
  0xf6   : > { %v960_v29 = vsel %vm4135_vm13, %v955_v15, %v959_v60  ;;  %v1991_v31 = vrot.slane %v1989_v19, 5  ;;  %v1216_v33 = vsel %vm4099_vm10, %v3020_v3, %v1215_v11  ;;  %v1997_v34 = vrot.slane %v1995_v27, 5  ;;  %v1159_v60 = vld [vmem:[%s4103_s5 + $0x2c] sm:$0x1]  ;;  %v3564_v3 = vld [vmem:[%s4103_s5 + $0x18] sm:$0xff]   ;;  %871 = vst.msk [vmem:[#allocation3 + $0xa8] sm:$0xff] %vm863_vm14, %v3563_v62 }
  0xf7   : > { %1386 = vrot.lane.b32.xlu1 %v3535_v7, %s3710_s6  ;;  %v970_v24 = vsel %vm4135_vm13, %v965_v25, %v969_v9  ;;  %v2005_v35 = vshll.u32 %v3166_v12, 16  ;;  %v1219_v39 = vsel %vm4099_vm10, %v1217_v26, %v1218_v16  ;;  %v2001_v41 = vrot.slane %v1999_v32, 4  ;;  %v3565_v8 = vld [vmem:[#allocation4 + $0x80] sm:$0xff]   ;;  %v3168_v15 = vld [vmem:[%s4103_s5 + $0x40] sm:$0xf]  ;;  %3356 = vmatpush3.bf16.msra.mxu0 %v3561_v54  ;;  %866 = vst.msk [vmem:[#allocation3 + $0x30] sm:$0xff] %vm863_vm14, %v3564_v3 }
  0xf8   : > { %v3012_v37 = vcombine.low %v960_v29, %v970_v24  ;;  %v1992_v40 = vor.u32 %v1991_v31, %v1988_v30  ;;  %1793 = vrot.lane.b32.xlu0 %v3126_v23, %s3711_s21  ;;  %v3119_v45 = vrot.slane %v4301_v20, 9  ;;  %v1732_v46 = vrot.slane %v4304_v21, 5  ;;  %3450 = vmatpush3.bf16.msra.mxu1 %v3561_v54  ;;  %v3537_v18 = vld [vmem:[%s4103_s5 + $0x24] sm:$0xff]   ;;  %v3105_v29 = vld [vmem:[%s4103_s5 + $0x40] sm:$0xf] }
  0xf9   : > { %v2007_v44 = vrot.slane %v2005_v35, 5  ;;  %v1735_v47 = vrot.slane %v4307_v22, 5  ;;  %v2002_v50 = vor.u32 %v2001_v41, %v1997_v34  ;;  %v972_v51 = vshrl.u32 %v881_v28, 16  ;;  %v3169_v22 = vld [vmem:[%s4103_s5 + $0x44] sm:$0x1]  ;;  %3415 = vmatprep.subr.bf16.mxu1 %v3565_v8 }
  0xfa   : > { %v1993_v49 = vrot.slane %v1992_v40, 4  ;;  %v975_v52 = vshll.u32 %v881_v28, 16  ;;  %v3028_v56 = vcombine.low %v1216_v33, %v1219_v39  ;;  %v1734_v57 = vrot.slane %v1732_v46, 4  ;;  %v3104_v28 = vld [vmem:[%s4103_s5 + $0x3c] sm:$0xe]  ;;  %v3567_v33 = vld [vmem:[%s4103_s5 + $0x24] sm:$0xff]  }
  0xfb   : > { %1119 = vrot.lane.b32.xlu1 %v3012_v37, %s3711_s21  ;;  %v981_v58 = vshll.u32 %v882_v42, 16  ;;  %v985_v59 = vshrl.u32 %v882_v42, 16  ;;  %v2003_v0 = vrot.slane %v2002_v50, 4  ;;  %v974_v1 = vrot.slane %v972_v51, 4  ;;  %v3106_v24 = vld [vmem:[%s4103_s5 + $0x44] sm:$0x1] }
  0xfc   : > { %v1998_v63 = vsel %vm4135_vm13, %v1993_v49, %v1997_v34  ;;  %v977_v2 = vrot.slane %v975_v52, 5  ;;  %1885 = vrot.lane.b32.xlu0 %v3536_v38, %s3709_s15  ;;  %v1733_v4 = vsel %vm4099_vm10, %v3119_v45, %v1732_v46  ;;  %v991_v7 = vshll.u32 %v883_v43, 16  ;;  %v3538_v39 = vld [vmem:[%s4103_s5 + $0x3c] sm:$0xff]   ;;  %v884_v43 = vld [vmem:[%s4103_s5 + $0x30] sm:$0xf]  ;;  %867 = vst.msk [vmem:[#allocation3 + $0x48] sm:$0xff] %vm863_vm14, %v3567_v33 }
  0xfd   : > { %v983_v5 = vrot.slane %v981_v58, 5  ;;  %v987_v6 = vrot.slane %v985_v59, 4  ;;  %v2008_v9 = vsel %vm4135_vm13, %v2003_v0, %v2007_v44  ;;  %v1736_v11 = vsel %vm4099_vm10, %v1734_v57, %v1735_v47  ;;  %v886_v49 = vld [vmem:[%s4103_s5 + $0x38] sm:$0x1]  ;;  %v3568_v50 = vld [vmem:[%s4103_s5 + $0x30] sm:$0xff]  }
  0xfe   : > { %v978_v12 = vor.u32 %v977_v2, %v974_v1  ;;  %v3021_v13 = vrot.slane %v4328_v48, 9  ;;  %v3184_v16 = vcombine.low %v1998_v63, %v2008_v9  ;;  %v993_v20 = vrot.slane %v991_v7, 5  ;;  %v885_v48 = vld [vmem:[%s4103_s5 + $0x34] sm:$0xf]  ;;  %v1160_v55 = vld [vmem:[%s4103_s5 + $0x30] sm:$0xe] }
  0xff   : > { %1283 = vrot.lane.b32.xlu1 %v3028_v56, %s3709_s15  ;;  %v988_v19 = vor.u32 %v987_v6, %v983_v5  ;;  %v1222_v21 = vrot.slane %v4331_v53, 5  ;;  %v1225_v25 = vrot.slane %v1159_v60, 5  ;;  %v2010_v26 = vshrl.u32 %v3167_v61, 16  ;;  %v1161_v60 = vld [vmem:[%s4103_s5 + $0x34] sm:$0xf]  ;;  %868 = vst.msk [vmem:[#allocation3 + $0x60] sm:$0xff] %vm863_vm14, %v3568_v50 }
 0x100   : > { %v979_v23 = vrot.slane %v978_v12, 4  ;;  %v2013_v27 = vshll.u32 %v3167_v61, 16  ;;  %2157 = vrot.lane.b32.xlu0 %v3184_v16, %s3710_s6  ;;  %v3127_v30 = vcombine.low %v1733_v4, %v1736_v11  ;;  %v2019_v17 = vshll.u32 %v3168_v15, 16  ;;  %v1162_v1 = vld [vmem:[%s4103_s5 + $0x38] sm:$0x1] }
 0x101   : > { %v989_v31 = vrot.slane %v988_v19, 4  ;;  %v1224_v32 = vrot.slane %v1222_v21, 4  ;;  %v2012_v35 = vrot.slane %v2010_v26, 4  ;;  %v2023_v37 = vshrl.u32 %v3168_v15, 16  ;;  %v3170_v2 = vld [vmem:[%s4103_s5 + $0x48] sm:$0xf] }
 0x102   : > { %v984_v34 = vsel %vm4135_vm13, %v979_v23, %v983_v5  ;;  %v2015_v36 = vrot.slane %v2013_v27, 5  ;;  %v1223_v40 = vsel %vm4099_vm10, %v3021_v13, %v1222_v21  ;;  %v2021_v41 = vrot.slane %v2019_v17, 5  ;;  %v889_v50 = vld [vmem:[%s4103_s5 + $0x44] sm:$0x1] }
 0x103   : > { %1376 = vrot.lane.b32.xlu1 %v3537_v18, %s3710_s6  ;;  %v994_v38 = vsel %vm4135_vm13, %v989_v31, %v993_v20  ;;  %v2029_v42 = vshll.u32 %v3169_v22, 16  ;;  %v1226_v45 = vsel %vm4099_vm10, %v1224_v32, %v1225_v25  ;;  %v2025_v47 = vrot.slane %v2023_v37, 4  ;;  %v3171_v18 = vld [vmem:[%s4103_s5 + $0x4c] sm:$0xf]  ;;  %v3539_v20 = vld [vmem:[%s4103_s5 + $0x30] sm:$0xff]  }
 0x104   : > { %v3013_v44 = vcombine.low %v984_v34, %v994_v38  ;;  %v2016_v46 = vor.u32 %v2015_v36, %v2012_v35  ;;  %1795 = vrot.lane.b32.xlu0 %v3127_v30, %s3711_s21  ;;  %v3120_v52 = vrot.slane %v3104_v28, 9  ;;  %v1739_v53 = vrot.slane %v3105_v29, 5  ;;  %v3172_v25 = vld [vmem:[%s4103_s5 + $0x50] sm:$0x1]  ;;  %v3107_v30 = vld [vmem:[%s4103_s5 + $0x48] sm:$0xe] }
 0x105   : > { %v2031_v51 = vrot.slane %v2029_v42, 5  ;;  %v1742_v54 = vrot.slane %v3106_v24, 5  ;;  %v2026_v57 = vor.u32 %v2025_v47, %v2021_v41  ;;  %v996_v58 = vshrl.u32 %v884_v43, 16  ;;  %v3108_v31 = vld [vmem:[%s4103_s5 + $0x4c] sm:$0xf] }
 0x106   : > { %v2017_v56 = vrot.slane %v2016_v46, 4  ;;  %v999_v59 = vshll.u32 %v884_v43, 16  ;;  %v3029_v61 = vcombine.low %v1223_v40, %v1226_v45  ;;  %v1741_v62 = vrot.slane %v1739_v53, 4  ;;  %v3109_v34 = vld [vmem:[%s4103_s5 + $0x50] sm:$0x1]  ;;  %v3540_v40 = vld [vmem:[%s4103_s5 + $0x48] sm:$0xff]  }
 0x107   : > { %1121 = vrot.lane.b32.xlu1 %v3013_v44, %s3711_s21  ;;  %v1005_v63 = vshll.u32 %v885_v48, 16  ;;  %v1009_v0 = vshrl.u32 %v885_v48, 16  ;;  %v2027_v4 = vrot.slane %v2026_v57, 4  ;;  %v998_v5 = vrot.slane %v996_v58, 4  ;;  %v887_v44 = vld [vmem:[%s4103_s5 + $0x3c] sm:$0xf] }
 0x108   : > { %v2022_v3 = vsel %vm4135_vm13, %v2017_v56, %v2021_v41  ;;  %v1001_v6 = vrot.slane %v999_v59, 5  ;;  %1887 = vrot.lane.b32.xlu0 %v3538_v39, %s3709_s15  ;;  %v1740_v7 = vsel %vm4099_vm10, %v3120_v52, %v1739_v53  ;;  %v1015_v11 = vshll.u32 %v886_v49, 16  ;;  %v888_v49 = vld [vmem:[%s4103_s5 + $0x40] sm:$0xf]  ;;  %v1163_v56 = vld [vmem:[%s4103_s5 + $0x3c] sm:$0xe] }
 0x109   : > { %v1007_v8 = vrot.slane %v1005_v63, 5  ;;  %v1011_v9 = vrot.slane %v1009_v0, 4  ;;  %v2032_v12 = vsel %vm4135_vm13, %v2027_v4, %v2031_v51  ;;  %v1743_v13 = vsel %vm4099_vm10, %v1741_v62, %v1742_v54  ;;  %v3569_v51 = vld [vmem:[%s4103_s5 + $0x3c] sm:$0xff]  }
 0x10a   : > { %v1002_v15 = vor.u32 %v1001_v6, %v998_v5  ;;  %v3022_v16 = vrot.slane %v1160_v55, 9  ;;  %v3185_v19 = vcombine.low %v2022_v3, %v2032_v12  ;;  %v1017_v22 = vrot.slane %v1015_v11, 5  ;;  %869 = vst.msk [vmem:[#allocation3 + $0x78] sm:$0xff] %vm863_vm14, %v3569_v51  ;;  %v3173_v3 = vld [vmem:[%s4103_s5 + $0x54] sm:$0xf] }
 0x10b   : > { %1285 = vrot.lane.b32.xlu1 %v3029_v61, %s3709_s15  ;;  %v1012_v21 = vor.u32 %v1011_v9, %v1007_v8  ;;  %v1229_v23 = vrot.slane %v1161_v60, 5  ;;  %v1232_v27 = vrot.slane %v1162_v1, 5  ;;  %v2034_v28 = vshrl.u32 %v3170_v2, 16  ;;  %v1164_v61 = vld [vmem:[%s4103_s5 + $0x40] sm:$0xf] }
 0x10c   : > { %v1003_v26 = vrot.slane %v1002_v15, 4  ;;  %v2037_v29 = vshll.u32 %v3170_v2, 16  ;;  %2159 = vrot.lane.b32.xlu0 %v3185_v19, %s3710_s6  ;;  %v3128_v32 = vcombine.low %v1740_v7, %v1743_v13  ;;  %v2043_v33 = vshll.u32 %v3171_v18, 16  ;;  %v1165_v2 = vld [vmem:[%s4103_s5 + $0x44] sm:$0x1] }
 0x10d   : > { %v1013_v17 = vrot.slane %v1012_v21, 4  ;;  %v1231_v24 = vrot.slane %v1229_v23, 4  ;;  %v2036_v36 = vrot.slane %v2034_v28, 4  ;;  %v2047_v38 = vshrl.u32 %v3171_v18, 16  ;;  %v3175_v21 = vld [vmem:[%s4103_s5 + $0x5c] sm:$0x1] }
 0x10e   : > { %v1008_v35 = vsel %vm4135_vm13, %v1003_v26, %v1007_v8  ;;  %v2039_v37 = vrot.slane %v2037_v29, 5  ;;  %v1230_v41 = vsel %vm4099_vm10, %v3022_v16, %v1229_v23  ;;  %v2045_v42 = vrot.slane %v2043_v33, 5  ;;  %v3174_v8 = vld [vmem:[%s4103_s5 + $0x58] sm:$0xf]  ;;  %v3541_v16 = vld [vmem:[%s4103_s5 + $0x3c] sm:$0xff]  }
 0x10f   : > { %1378 = vrot.lane.b32.xlu1 %v3539_v20, %s3710_s6  ;;  %v1018_v39 = vsel %vm4135_vm13, %v1013_v17, %v1017_v22  ;;  %v2053_v43 = vshll.u32 %v3172_v25, 16  ;;  %v1233_v46 = vsel %vm4099_vm10, %v1231_v24, %v1232_v27  ;;  %v2049_v48 = vrot.slane %v2047_v38, 4 }
 0x110   : > { %v3014_v45 = vcombine.low %v1008_v35, %v1018_v39  ;;  %v2040_v47 = vor.u32 %v2039_v37, %v2036_v36  ;;  %1797 = vrot.lane.b32.xlu0 %v3128_v32, %s3711_s21  ;;  %v3121_v53 = vrot.slane %v3107_v30, 9  ;;  %v1746_v54 = vrot.slane %v3108_v31, 5 }
 0x111   : > { %v2055_v52 = vrot.slane %v2053_v43, 5  ;;  %v1749_v55 = vrot.slane %v3109_v34, 5  ;;  %v2050_v58 = vor.u32 %v2049_v48, %v2045_v42  ;;  %v1020_v59 = vshrl.u32 %v887_v44, 16  ;;  %v3061_v48 = vld [vmem:[%s4103_s5 + $0x10] sm:$0xf] }
 0x112   : > { %v2041_v57 = vrot.slane %v2040_v47, 4  ;;  %v1023_v60 = vshll.u32 %v887_v44, 16  ;;  %v3030_v62 = vcombine.low %v1230_v41, %v1233_v46  ;;  %v1748_v63 = vrot.slane %v1746_v54, 4  ;;  %v3060_v46 = vld [vmem:[%s4103_s5 + $0xc] sm:$0xf] }
 0x113   : > { %1123 = vrot.lane.b32.xlu1 %v3014_v45, %s3711_s21  ;;  %v1029_v0 = vshll.u32 %v888_v49, 16  ;;  %v1033_v1 = vshrl.u32 %v888_v49, 16  ;;  %v2051_v5 = vrot.slane %v2050_v58, 4  ;;  %v1022_v6 = vrot.slane %v1020_v59, 4  ;;  %v3062_v49 = vld [vmem:[%s4103_s5 + $0x14] sm:$0x1] }
 0x114   : > { %v2046_v4 = vsel %vm4135_vm13, %v2041_v57, %v2045_v42  ;;  %v1025_v7 = vrot.slane %v1023_v60, 5  ;;  %1889 = vrot.lane.b32.xlu0 %v3540_v40, %s3709_s15  ;;  %v1747_v9 = vsel %vm4099_vm10, %v3121_v53, %v1746_v54  ;;  %v1039_v13 = vshll.u32 %v889_v50, 16  ;;  %v3542_v42 = vld [vmem:[%s4103_s5 + $0x54] sm:$0xff]  }
 0x115   : > { %v1031_v11 = vrot.slane %v1029_v0, 5  ;;  %v1035_v12 = vrot.slane %v1033_v1, 4  ;;  %v2056_v15 = vsel %vm4135_vm13, %v2051_v5, %v2055_v52  ;;  %v1750_v18 = vsel %vm4099_vm10, %v1748_v63, %v1749_v55  ;;  %v3543_v63 = vld [vmem:[%s4103_s5 + $0x48] sm:$0xff]   ;;  %v3079_v5 = vld [vmem:[%s4103_s5 + $0x58] sm:$0xf] }
 0x116   : > { %v1026_v19 = vor.u32 %v1025_v7, %v1022_v6  ;;  %v3023_v20 = vrot.slane %v1163_v56, 9  ;;  %v3186_v22 = vcombine.low %v2046_v4, %v2056_v15  ;;  %v1041_v25 = vrot.slane %v1039_v13, 5  ;;  %v3080_v6 = vld [vmem:[%s4103_s5 + $0x5c] sm:$0x1] }
 0x117   : > { %1287 = vrot.lane.b32.xlu1 %v3030_v62, %s3709_s15  ;;  %v1036_v23 = vor.u32 %v1035_v12, %v1031_v11  ;;  %v1236_v26 = vrot.slane %v1164_v61, 5  ;;  %v1239_v28 = vrot.slane %v1165_v2, 5  ;;  %v2058_v29 = vshrl.u32 %v3173_v3, 16  ;;  %v3078_v2 = vld [vmem:[%s4103_s5 + $0x54] sm:$0xf] }
 0x118   : > { %v1027_v27 = vrot.slane %v1026_v19, 4  ;;  %v2061_v30 = vshll.u32 %v3173_v3, 16  ;;  %2161 = vrot.lane.b32.xlu0 %v3186_v22, %s3710_s6  ;;  %v3129_v31 = vcombine.low %v1747_v9, %v1750_v18  ;;  %v2067_v24 = vshll.u32 %v3174_v8, 16 }
 0x119   : > { %v1037_v32 = vrot.slane %v1036_v23, 4  ;;  %v1238_v17 = vrot.slane %v1236_v26, 4  ;;  %v2060_v34 = vrot.slane %v2058_v29, 4  ;;  %v2071_v36 = vshrl.u32 %v3174_v8, 16 }
 0x11a   : > { %v1032_v33 = vsel %vm4135_vm13, %v1027_v27, %v1031_v11  ;;  %v2063_v35 = vrot.slane %v2061_v30, 5  ;;  %v1237_v38 = vsel %vm4099_vm10, %v3023_v20, %v1236_v26  ;;  %v2069_v39 = vrot.slane %v2067_v24, 5 }
 0x11b   : > { %1380 = vrot.lane.b32.xlu1 %v3541_v16, %s3710_s6  ;;  %v1042_v37 = vsel %vm4135_vm13, %v1037_v32, %v1041_v25  ;;  %v2077_v40 = vshll.u32 %v3175_v21, 16  ;;  %v1240_v43 = vsel %vm4099_vm10, %v1238_v17, %v1239_v28  ;;  %v2073_v45 = vrot.slane %v2071_v36, 4 }
 0x11c   : > { %v3015_v41 = vcombine.low %v1032_v33, %v1042_v37  ;;  %v2064_v44 = vor.u32 %v2063_v35, %v2060_v34  ;;  %1799 = vrot.lane.b32.xlu0 %v3129_v31, %s3711_s21  ;;  %v1430_v50 = vshrl.u32 %v3060_v46, 16  ;;  %v1433_v53 = vshll.u32 %v3060_v46, 16  ;;  %v3063_v33 = vld [vmem:[%s4103_s5 + $0x18] sm:$0xf]  ;;  %v3064_v34 = vld [vmem:[%s4103_s5 + $0x1c] sm:$0xf] }
 0x11d   : > { %v2079_v47 = vrot.slane %v2077_v40, 5  ;;  %v2074_v52 = vor.u32 %v2073_v45, %v2069_v39  ;;  %v1439_v54 = vshll.u32 %v3061_v48, 16  ;;  %v3031_v55 = vcombine.low %v1237_v38, %v1240_v43  ;;  %v3065_v35 = vld [vmem:[%s4103_s5 + $0x20] sm:$0x1] }
 0x11e   : > { %v2065_v51 = vrot.slane %v2064_v44, 4  ;;  %v1432_v56 = vrot.slane %v1430_v50, 4  ;;  %v1443_v57 = vshrl.u32 %v3061_v48, 16  ;;  %v1449_v58 = vshll.u32 %v3062_v49, 16  ;;  %v3081_v45 = vld [vmem:[%s4103_s5 + $0x60] sm:$0xf] }
 0x11f   : > { %1125 = vrot.lane.b32.xlu1 %v3015_v41, %s3711_s21  ;;  %v2075_v60 = vrot.slane %v2074_v52, 4  ;;  %v1435_v61 = vrot.slane %v1433_v53, 5  ;;  %v1441_v62 = vrot.slane %v1439_v54, 5  ;;  %v1574_v7 = vshrl.u32 %v3078_v2, 16  ;;  %v3083_v48 = vld [vmem:[%s4103_s5 + $0x68] sm:$0x1] }
 0x120   : > { %v2070_v59 = vsel %vm4135_vm13, %v2065_v51, %v2069_v39  ;;  %1891 = vrot.lane.b32.xlu0 %v3542_v42, %s3709_s15  ;;  %v1445_v0 = vrot.slane %v1443_v57, 4  ;;  %v1451_v1 = vrot.slane %v1449_v58, 5  ;;  %v1577_v8 = vshll.u32 %v3078_v2, 16  ;;  %v3066_v58 = vld [vmem:[%s4103_s5 + $0x24] sm:$0xf] }
 0x121   : > { %v2080_v3 = vsel %vm4135_vm13, %v2075_v60, %v2079_v47  ;;  %v1436_v4 = vor.u32 %v1435_v61, %v1432_v56  ;;  %v1583_v12 = vshll.u32 %v3079_v5, 16  ;;  %v1587_v13 = vshrl.u32 %v3079_v5, 16  ;;  %v3082_v47 = vld [vmem:[%s4103_s5 + $0x64] sm:$0xf]  ;;  %v3068_v2 = vld [vmem:[%s4103_s5 + $0x2c] sm:$0x1] }
 0x122   : > { %v3187_v9 = vcombine.low %v2070_v59, %v2080_v3  ;;  %v1446_v11 = vor.u32 %v1445_v0, %v1441_v62  ;;  %v1576_v16 = vrot.slane %v1574_v7, 4  ;;  %v1579_v18 = vrot.slane %v1577_v8, 5 }
 0x123   : > { %1289 = vrot.lane.b32.xlu1 %v3031_v55, %s3709_s15  ;;  %v1437_v15 = vrot.slane %v1436_v4, 4  ;;  %v1593_v19 = vshll.u32 %v3080_v6, 16  ;;  %v1585_v21 = vrot.slane %v1583_v12, 5  ;;  %v1589_v22 = vrot.slane %v1587_v13, 4 }
 0x124   : > { %2163 = vrot.lane.b32.xlu0 %v3187_v9, %s3710_s6  ;;  %v1447_v20 = vrot.slane %v1446_v11, 4  ;;  %v1580_v25 = vor.u32 %v1579_v18, %v1576_v16  ;;  %v1454_v36 = vshrl.u32 %v3063_v33, 16  ;;  %v1457_v37 = vshll.u32 %v3063_v33, 16 }
 0x125   : > { %v1442_v23 = vsel %vm4135_vm13, %v1437_v15, %v1441_v62  ;;  %v1595_v26 = vrot.slane %v1593_v19, 5  ;;  %v1590_v28 = vor.u32 %v1589_v22, %v1585_v21  ;;  %v1463_v38 = vshll.u32 %v3064_v34, 16 }
 0x126   : > { %v1452_v27 = vsel %vm4135_vm13, %v1447_v20, %v1451_v1  ;;  %v1581_v30 = vrot.slane %v1580_v25, 4  ;;  %v1467_v39 = vshrl.u32 %v3064_v34, 16  ;;  %v1473_v40 = vshll.u32 %v3065_v35, 16  ;;  %v3069_v25 = vld [vmem:[%s4103_s5 + $0x30] sm:$0xf] }
 0x127   : > { %1382 = vrot.lane.b32.xlu1 %v3543_v63, %s3710_s6  ;;  %v3084_v29 = vcombine.low %v1442_v23, %v1452_v27  ;;  %v1591_v31 = vrot.slane %v1590_v28, 4  ;;  %v1456_v41 = vrot.slane %v1454_v36, 4  ;;  %v1459_v42 = vrot.slane %v1457_v37, 5  ;;  %v3067_v63 = vld [vmem:[%s4103_s5 + $0x28] sm:$0xf] }
 0x128   : > { %v1586_v32 = vsel %vm4135_vm13, %v1581_v30, %v1585_v21  ;;  %v1465_v43 = vrot.slane %v1463_v38, 5  ;;  %v1469_v44 = vrot.slane %v1467_v39, 4  ;;  %v1475_v46 = vrot.slane %v1473_v40, 5  ;;  %v3070_v30 = vld [vmem:[%s4103_s5 + $0x34] sm:$0xf] }
 0x129   : > { %1653 = vst.msk [vmem:[#allocation3 + $0x8] sm:$0xff] %vm863_vm14, %v3084_v29  ;;  %v1596_v17 = vsel %vm4135_vm13, %v1591_v31, %v1595_v26  ;;  %v1598_v49 = vshrl.u32 %v3081_v45, 16  ;;  %v1460_v50 = vor.u32 %v1459_v42, %v1456_v41  ;;  %v1601_v52 = vshll.u32 %v3081_v45, 16  ;;  %v3071_v31 = vld [vmem:[%s4103_s5 + $0x38] sm:$0x1] }
 0x12a   : > { %v3090_v24 = vcombine.low %v1586_v32, %v1596_v17  ;;  %v1470_v51 = vor.u32 %v1469_v44, %v1465_v43  ;;  %v1607_v53 = vshll.u32 %v3082_v47, 16  ;;  %v1611_v56 = vshrl.u32 %v3082_v47, 16  ;;  %v3190_v38 = vld [vmem:[%s4103_s5 + $0x18] sm:$0xe]  ;;  %v3192_v47 = vld [vmem:[%s4103_s5 + $0x20] sm:$0x1] }
 0x12b   : > { %v1600_v55 = vrot.slane %v1598_v49, 4  ;;  %v1617_v57 = vshll.u32 %v3083_v48, 16  ;;  %v1461_v59 = vrot.slane %v1460_v50, 4  ;;  %v1603_v61 = vrot.slane %v1601_v52, 5 }
 0x12c   : > { %1659 = vst.msk [vmem:[#allocation3 + $0x98] sm:$0xff] %vm863_vm14, %v3090_v24  ;;  %v1471_v60 = vrot.slane %v1470_v51, 4  ;;  %v1609_v62 = vrot.slane %v1607_v53, 5  ;;  %v1613_v0 = vrot.slane %v1611_v56, 4  ;;  %v1478_v3 = vshrl.u32 %v3066_v58, 16 }
 0x12d   : > { %v1619_v1 = vrot.slane %v1617_v57, 5  ;;  %v1481_v4 = vshll.u32 %v3066_v58, 16  ;;  %v1466_v6 = vsel %vm4135_vm13, %v1461_v59, %v1465_v43  ;;  %v1604_v8 = vor.u32 %v1603_v61, %v1600_v55  ;;  %v3191_v43 = vld [vmem:[%s4103_s5 + $0x1c] sm:$0xf]  ;;  %v3193_v53 = vld [vmem:[%s4103_s5 + $0x24] sm:$0xe] }
 0x12e   : > { %v1476_v7 = vsel %vm4135_vm13, %v1471_v60, %v1475_v46  ;;  %v1487_v9 = vshll.u32 %v3067_v63, 16  ;;  %v1614_v12 = vor.u32 %v1613_v0, %v1609_v62  ;;  %v1480_v13 = vrot.slane %v1478_v3, 4  ;;  %v3194_v58 = vld [vmem:[%s4103_s5 + $0x28] sm:$0xf]  ;;  %v3195_v59 = vld [vmem:[%s4103_s5 + $0x2c] sm:$0x1] }
 0x12f   : > { %v3085_v11 = vcombine.low %v1466_v6, %v1476_v7  ;;  %v1483_v15 = vrot.slane %v1481_v4, 5  ;;  %v1605_v16 = vrot.slane %v1604_v8, 4  ;;  %v1491_v19 = vshrl.u32 %v3067_v63, 16  ;;  %v3198_v6 = vld [vmem:[%s4103_s5 + $0x38] sm:$0x1] }
 0x130   : > { %v1882_v54 = vpop.permute.xlu1 %1881  ;;  %v1489_v18 = vrot.slane %v1487_v9, 5  ;;  %v1497_v20 = vshll.u32 %v3068_v2, 16  ;;  %v1615_v22 = vrot.slane %v1614_v12, 4  ;;  %v1502_v24 = vshrl.u32 %v3069_v25, 16  ;;  %v3197_v2 = vld [vmem:[%s4103_s5 + $0x34] sm:$0xf] }
 0x131   : > { %1654 = vst.msk [vmem:[#allocation3 + $0x20] sm:$0xff] %vm863_vm14, %v3085_v11  ;;  %v1484_v23 = vor.u32 %v1483_v15, %v1480_v13  ;;  %v1610_v27 = vsel %vm4135_vm13, %v1605_v16, %v1609_v62  ;;  %v1493_v28 = vrot.slane %v1491_v19, 4  ;;  %v1505_v33 = vshll.u32 %v3069_v25, 16  ;;  %v3199_v13 = vld [vmem:[%s4103_s5 + $0x3c] sm:$0xe] }
 0x132   : > { %v1499_v29 = vrot.slane %v1497_v20, 5  ;;  %v1620_v32 = vsel %vm4135_vm13, %v1615_v22, %v1619_v1  ;;  %v1511_v36 = vshll.u32 %v3070_v30, 16  ;;  %v1515_v37 = vshrl.u32 %v3070_v30, 16  ;;  %v3196_v1 = vld [vmem:[%s4103_s5 + $0x30] sm:$0xe] }
 0x133   : > { %v1485_v17 = vrot.slane %v1484_v23, 4  ;;  %v3091_v34 = vcombine.low %v1610_v27, %v1620_v32  ;;  %v1494_v35 = vor.u32 %v1493_v28, %v1489_v18  ;;  %v1504_v40 = vrot.slane %v1502_v24, 4  ;;  %v3200_v15 = vld [vmem:[%s4103_s5 + $0x40] sm:$0xf]  ;;  %v3072_v22 = vld [vmem:[%s4103_s5 + $0x3c] sm:$0xf] }
 0x134   : > { %v1373_v21 = vpop.permute.xlu1 %1372  ;;  %v1507_v41 = vrot.slane %v1505_v33, 5  ;;  %v1521_v42 = vshll.u32 %v3071_v31, 16  ;;  %v1513_v45 = vrot.slane %v1511_v36, 5  ;;  %v1517_v46 = vrot.slane %v1515_v37, 4  ;;  %v3074_v30 = vld [vmem:[%s4103_s5 + $0x44] sm:$0x1] }
 0x135   : > { %v1490_v39 = vsel %vm4135_vm13, %v1485_v17, %v1489_v18  ;;  %1660 = vst.msk [vmem:[#allocation3 + $0xb0] sm:$0xff] %vm863_vm14, %v3091_v34  ;;  %v1495_v44 = vrot.slane %v1494_v35, 4  ;;  %v3214_v48 = vrot.slane %v3190_v38, 9  ;;  %v2235_v51 = vrot.slane %v3191_v43, 5  ;;  %v3202_v37 = vld [vmem:[%s4103_s5 + $0x48] sm:$0xe] }
 0x136   : > { %v1790_v5 = vpop.permute.xlu0 %1789  ;;  %v1508_v50 = vor.u32 %v1507_v41, %v1504_v40  ;;  %v2238_v52 = vrot.slane %v3192_v47, 5  ;;  %v1518_v56 = vor.u32 %v1517_v46, %v1513_v45  ;;  %v1523_v57 = vrot.slane %v1521_v42, 5  ;;  %v3203_v42 = vld [vmem:[%s4103_s5 + $0x4c] sm:$0xf]  ;;  %v3204_v43 = vld [vmem:[%s4103_s5 + $0x50] sm:$0x1] }
 0x137   : > { %1813 = vst.msk [vmem:[#allocation3 + $0x8] sm:$0xff] %vm1139_vm15, %v1790_v5  ;;  %v1500_v55 = vsel %vm4135_vm13, %v1495_v44, %v1499_v29  ;;  %v3215_v60 = vrot.slane %v3193_v53, 9  ;;  %v2236_v63 = vsel %vm4099_vm10, %v3214_v48, %v2235_v51  ;;  %v2237_v0 = vrot.slane %v2235_v51, 4  ;;  %v3073_v29 = vld [vmem:[%s4103_s5 + $0x40] sm:$0xf] }
 0x138   : > { %1905 = vst.msk [vmem:[#allocation3 + $0x8] sm:$0xff] %vm1303_vm0, %v1882_v54  ;;  %v3086_v61 = vcombine.low %v1490_v39, %v1500_v55  ;;  %v1509_v62 = vrot.slane %v1508_v50, 4  ;;  %v1519_v3 = vrot.slane %v1518_v56, 4  ;;  %v2242_v4 = vrot.slane %v3194_v58, 5  ;;  %v3206_v55 = vld [vmem:[%s4103_s5 + $0x58] sm:$0xf] }
 0x139   : > { %v2245_v5 = vrot.slane %v3195_v59, 5  ;;  %v3216_v7 = vrot.slane %v3196_v1, 9  ;;  %v2239_v9 = vsel %vm4099_vm10, %v2237_v0, %v2238_v52  ;;  %v2249_v11 = vrot.slane %v3197_v2, 5  ;;  %v3207_v59 = vld [vmem:[%s4103_s5 + $0x5c] sm:$0x1] }
 0x13a   : > { %v1802_v26 = vpop.permute.xlu0 %1801  ;;  %1655 = vst.msk [vmem:[#allocation3 + $0x38] sm:$0xff] %vm863_vm14, %v3086_v61  ;;  %v1514_v8 = vsel %vm4135_vm13, %v1509_v62, %v1513_v45  ;;  %v2252_v12 = vrot.slane %v3198_v6, 5  ;;  %v1524_v16 = vsel %vm4135_vm13, %v1519_v3, %v1523_v57  ;;  %v3222_v18 = vcombine.low %v2236_v63, %v2239_v9  ;;  %v3076_v2 = vld [vmem:[%s4103_s5 + $0x4c] sm:$0xf] }
 0x13b   : > { %1819 = vst.msk [vmem:[#allocation3 + $0x98] sm:$0xff] %vm1139_vm15, %v1802_v26  ;;  %v2243_v19 = vsel %vm4099_vm10, %v3215_v60, %v2242_v4  ;;  %v2244_v20 = vrot.slane %v2242_v4, 4  ;;  %v3087_v25 = vcombine.low %v1514_v8, %v1524_v16  ;;  %v2250_v26 = vsel %vm4099_vm10, %v3216_v7, %v2249_v11  ;;  %v3075_v60 = vld [vmem:[%s4103_s5 + $0x48] sm:$0xf]  ;;  %v3077_v8 = vld [vmem:[%s4103_s5 + $0x50] sm:$0x1] }
 0x13c   : > { %v2251_v27 = vrot.slane %v2249_v11, 4  ;;  %v3217_v28 = vrot.slane %v3199_v13, 9  ;;  %2321 = vst.msk [vmem:[#allocation3 + $0x10] sm:$0xff] %vm863_vm14, %v3222_v18  ;;  %v2256_v32 = vrot.slane %v3200_v15, 5  ;;  %v1526_v24 = vshrl.u32 %v3072_v22, 16 }
 0x13d   : > { %v1280_v49 = vpop.permute.xlu1 %1279  ;;  %v2246_v31 = vsel %vm4099_vm10, %v2244_v20, %v2245_v5  ;;  %1656 = vst.msk [vmem:[#allocation3 + $0x50] sm:$0xff] %vm863_vm14, %v3087_v25  ;;  %v1529_v35 = vshll.u32 %v3072_v22, 16  ;;  %v1535_v36 = vshll.u32 %v3073_v29, 16  ;;  %v1539_v47 = vshrl.u32 %v3073_v29, 16  ;;  %v3209_v22 = vld [vmem:[%s4103_s5 + $0x64] sm:$0xf] }
 0x13e   : > { %v3223_v33 = vcombine.low %v2243_v19, %v2246_v31  ;;  %v2253_v34 = vsel %vm4099_vm10, %v2251_v27, %v2252_v12  ;;  %v2257_v39 = vsel %vm4099_vm10, %v3217_v28, %v2256_v32  ;;  %v2258_v40 = vrot.slane %v2256_v32, 4  ;;  %v3210_v29 = vld [vmem:[%s4103_s5 + $0x68] sm:$0x1] }
 0x13f   : > { %v1116_v54 = vpop.permute.xlu0 %1115  ;;  %v3224_v38 = vcombine.low %v2250_v26, %v2253_v34  ;;  %v1528_v41 = vrot.slane %v1526_v24, 4  ;;  %v1531_v45 = vrot.slane %v1529_v35, 5  ;;  %v1537_v46 = vrot.slane %v1535_v36, 5  ;;  %v3211_v24 = vld [vmem:[%s4103_s5 + $0x6c] sm:$0xe] }
 0x140   : > { %1140 = vst.msk [vmem:[#allocation3] sm:$0xff] %vm1139_vm15, %v1116_v54  ;;  %v1545_v48 = vshll.u32 %v3074_v30, 16  ;;  %v3218_v52 = vrot.slane %v3202_v37, 9  ;;  %v2263_v53 = vrot.slane %v3203_v42, 5  ;;  %v2266_v54 = vrot.slane %v3204_v43, 5 }
 0x141   : > { %1304 = vst.msk [vmem:[#allocation3] sm:$0xff] %vm1303_vm0, %v1280_v49  ;;  %v3205_v49 = vld [vmem:[%s4103_s5 + $0x54] sm:$0xe]  ;;  %v1532_v57 = vor.u32 %v1531_v45, %v1528_v41  ;;  %v1541_v58 = vrot.slane %v1539_v47, 4  ;;  %v2270_v1 = vrot.slane %v3206_v55, 5  ;;  %v2273_v7 = vrot.slane %v3207_v59, 5 }
 0x142   : > { %1397 = vst.msk [vmem:[#allocation3] sm:$0xff] %vm1396_vm1, %v1373_v21  ;;  %v3201_v21 = vld [vmem:[%s4103_s5 + $0x44] sm:$0x1]  ;;  %v2264_v62 = vsel %vm4099_vm10, %v3218_v52, %v2263_v53  ;;  %v2265_v63 = vrot.slane %v2263_v53, 4  ;;  %v3219_v0 = vrot.slane %v3205_v49, 9  ;;  %v1547_v6 = vrot.slane %v1545_v48, 5 }
 0x143   : > { %v2259_v17 = vrot.slane %v3201_v21, 5  ;;  %2322 = vst.msk [vmem:[#allocation3 + $0x28] sm:$0xff] %vm863_vm14, %v3223_v33  ;;  %2323 = vst.msk [vmem:[#allocation3 + $0x40] sm:$0xff] %vm863_vm14, %v3224_v38  ;;  %v1533_v4 = vrot.slane %v1532_v57, 4  ;;  %v1542_v5 = vor.u32 %v1541_v58, %v1537_v46  ;;  %v2272_v13 = vrot.slane %v2270_v1, 4 }
 0x144   : > { %v2154_v23 = vpop.permute.xlu0 %2153  ;;  %v2267_v11 = vsel %vm4099_vm10, %v2265_v63, %v2266_v54  ;;  %v2271_v12 = vsel %vm4099_vm10, %v3219_v0, %v2270_v1  ;;  %v1550_v15 = vshrl.u32 %v3075_v60, 16  ;;  %v1553_v20 = vshll.u32 %v3075_v60, 16  ;;  %v3208_v21 = vld [vmem:[%s4103_s5 + $0x60] sm:$0xe]  ;;  %v3212_v38 = vld [vmem:[%s4103_s5 + $0x70] sm:$0xf] }
 0x145   : > { %2177 = vst.msk [vmem:[#allocation3 + $0x8] sm:$0xff] %vm1396_vm1, %v2154_v23  ;;  %v2260_v51 = vsel %vm4099_vm10, %v2258_v40, %v2259_v17  ;;  %v1538_v16 = vsel %vm4135_vm13, %v1533_v4, %v1537_v46  ;;  %v1543_v18 = vrot.slane %v1542_v5, 4  ;;  %v3226_v19 = vcombine.low %v2264_v62, %v2267_v11  ;;  %v3213_v43 = vld [vmem:[%s4103_s5 + $0x74] sm:$0x1]  ;;  %v3566_v63 = vld [vmem:[#allocation4 + $0x88] sm:$0xff]  }
 0x146   : > { %v3225_v56 = vcombine.low %v2257_v39, %v2260_v51  ;;  %v2274_v25 = vsel %vm4099_vm10, %v2272_v13, %v2273_v7  ;;  %v1552_v26 = vrot.slane %v1550_v15, 4  ;;  %v1559_v27 = vshll.u32 %v3076_v2, 16 }
 0x147   : > { %v1563_v28 = vshrl.u32 %v3076_v2, 16  ;;  %v1548_v30 = vsel %vm4135_vm13, %v1543_v18, %v1547_v6  ;;  %2325 = vst.msk [vmem:[#allocation3 + $0x70] sm:$0xff] %vm863_vm14, %v3226_v19  ;;  %v3227_v31 = vcombine.low %v2271_v12, %v2274_v25  ;;  %v1555_v32 = vrot.slane %v1553_v20, 5  ;;  %v2331_v20 = vld [vmem:[#allocation3 + $0x10] sm:$0xff] }
 0x148   : > { %v1894_v44 = vpop.permute.xlu0 %1893  ;;  %2324 = vst.msk [vmem:[#allocation3 + $0x58] sm:$0xff] %vm863_vm14, %v3225_v56  ;;  %v1569_v17 = vshll.u32 %v3077_v8, 16  ;;  %v3088_v34 = vcombine.low %v1538_v16, %v1548_v30  ;;  %v1561_v35 = vrot.slane %v1559_v27, 5  ;;  %v3220_v37 = vrot.slane %v3208_v21, 9 }
 0x149   : > { %v1128_v50 = vpop.permute.xlu1 %1127  ;;  %1911 = vst.msk [vmem:[#allocation3 + $0x98] sm:$0xff] %vm1303_vm0, %v1894_v44  ;;  %v2329_v61 = vld [vmem:[#allocation3] sm:$0xff]  ;;  %v1565_v36 = vrot.slane %v1563_v28, 4  ;;  %v1556_v39 = vor.u32 %v1555_v32, %v1552_v26  ;;  %v2277_v41 = vrot.slane %v3209_v22, 5  ;;  %v2280_v42 = vrot.slane %v3210_v29, 5 }
 0x14a   : > { %1146 = vst.msk [vmem:[#allocation3 + $0x90] sm:$0xff] %vm1139_vm15, %v1128_v50  ;;  %v1571_v40 = vrot.slane %v1569_v17, 5  ;;  %v3221_v46 = vrot.slane %v3211_v24, 9  ;;  %v2284_v47 = vrot.slane %v3212_v38, 5  ;;  %v2287_v48 = vrot.slane %v3213_v43, 5  ;;  %v2334_v27 = vld [vmem:[#allocation3 + $0x28] sm:$0xff] }
 0x14b   : > { %2326 = vst.msk [vmem:[#allocation3 + $0x88] sm:$0xff] %vm863_vm14, %v3227_v31  ;;  %1657 = vst.msk [vmem:[#allocation3 + $0x68] sm:$0xff] %vm863_vm14, %v3088_v34  ;;  %v1566_v45 = vor.u32 %v1565_v36, %v1561_v35  ;;  %v1557_v49 = vrot.slane %v1556_v39, 4  ;;  %v2278_v50 = vsel %vm4099_vm10, %v3220_v37, %v2277_v41  ;;  %v2279_v51 = vrot.slane %v2277_v41, 4  ;;  %v2337_v28 = vld [vmem:[#allocation3 + $0x40] sm:$0xff] }
 0x14c   : > { %v2330_v3 = vld [vmem:[#allocation3 + $0x8] sm:$0xff]  ;;  %v2285_v54 = vsel %vm4099_vm10, %v3221_v46, %v2284_v47  ;;  %v2286_v55 = vrot.slane %v2284_v47, 4 }
 0x14d   : > { %v1292_v9 = vpop.permute.xlu1 %1291  ;;  %2560 = vmatprep.mubr.bf16.mxu0 %v2330_v3  ;;  %v1567_v53 = vrot.slane %v1566_v45, 4  ;;  %v1562_v56 = vsel %vm4135_vm13, %v1557_v49, %v1561_v35  ;;  %v2281_v57 = vsel %vm4099_vm10, %v2279_v51, %v2280_v42 }
 0x14e   : > { %1310 = vst.msk [vmem:[#allocation3 + $0x90] sm:$0xff] %vm1303_vm0, %v1292_v9  ;;  %2561 = vmatmul.mubr.bf16.vlgmr.msra.gmra.mrb[0].mxu0 %v2329_v61  ;;  %v2166_v23 = vpop.permute.xlu0 %2165  ;;  %v3228_v61 = vcombine.low %v2278_v50, %v2281_v57  ;;  %v2288_v62 = vsel %vm4099_vm10, %v2286_v55, %v2287_v48  ;;  %v2343_v34 = vld [vmem:[#allocation3 + $0x70] sm:$0xff] }
 0x14f   : > { %2183 = vst.msk [vmem:[#allocation3 + $0x98] sm:$0xff] %vm1396_vm1, %v2166_v23  ;;  %v1572_v60 = vsel %vm4135_vm13, %v1567_v53, %v1571_v40  ;;  %v3229_v1 = vcombine.low %v2285_v54, %v2288_v62 }
 0x150   : > { %v3089_v0 = vcombine.low %v1562_v56, %v1572_v60  ;;  %2327 = vst.msk [vmem:[#allocation3 + $0xa0] sm:$0xff] %vm863_vm14, %v3228_v61 }
 0x151   : > { %v1385_v33 = vpop.permute.xlu1 %1384  ;;  %2328 = vst.msk [vmem:[#allocation3 + $0xb8] sm:$0xff] %vm863_vm14, %v3229_v1 }
 0x152   : > { %1403 = vst.msk [vmem:[#allocation3 + $0x90] sm:$0xff] %vm1396_vm1, %v1385_v33  ;;  %v1792_v44 = vpop.permute.xlu0 %1791  ;;  %v2340_v33 = vld [vmem:[#allocation3 + $0x58] sm:$0xff]  ;;  %v2346_v40 = vld [vmem:[#allocation3 + $0x88] sm:$0xff] }
 0x153   : > { %1814 = vst.msk [vmem:[#allocation3 + $0x20] sm:$0xff] %vm1139_vm15, %v1792_v44 }
 0x154   : > { %1658 = vst.msk [vmem:[#allocation3 + $0x80] sm:$0xff] %vm863_vm14, %v3089_v0 }
 0x155   : > { %v1118_v52 = vpop.permute.xlu1 %1117 }
 0x156   : > { %1141 = vst.msk [vmem:[#allocation3 + $0x18] sm:$0xff] %vm1139_vm15, %v1118_v52  ;;  %v1884_v58 = vpop.permute.xlu0 %1883  ;;  %v2348_v59 = vld [vmem:[#allocation3 + $0x98] sm:$0xff] }
 0x157   : > { %1906 = vst.msk [vmem:[#allocation3 + $0x20] sm:$0xff] %vm1303_vm0, %v1884_v58  ;;  %2608 = vmatprep.mubr.bf16.mxu1 %v2348_v59  ;;  %v2349_v41 = vld [vmem:[#allocation3 + $0xa0] sm:$0xff] }
 0x158   : > { %v2352_v47 = vld [vmem:[#allocation3 + $0xb8] sm:$0xff] }
 0x159   : > { %v1282_v2 = vpop.permute.xlu1 %1281  ;;  %v2347_v3 = vld [vmem:[#allocation3 + $0x90] sm:$0xff] }
 0x15a   : > { %1305 = vst.msk [vmem:[#allocation3 + $0x18] sm:$0xff] %vm1303_vm0, %v1282_v2  ;;  %2609 = vmatmul.mubr.bf16.vlgmr.msra.gmra.mrb[0].mxu1 %v2347_v3  ;;  %v2156_v14 = vpop.permute.xlu0 %2155 }
 0x15b   : > { %3416 = vmatpush3.bf16.msra.mxu1 %v3570_v10  ;;  %2178 = vst.msk [vmem:[#allocation3 + $0x20] sm:$0xff] %vm1396_vm1, %v2156_v14 }
 0x15c   : > { %3417 = vmatprep.subr.bf16.mxu1 %v3566_v63 }
 0x15d   : > { %v1375_v4 = vpop.permute.xlu1 %1374 }
 0x15e   : > { %1398 = vst.msk [vmem:[#allocation3 + $0x18] sm:$0xff] %vm1396_vm1, %v1375_v4  ;;  %v1804_v5 = vpop.permute.xlu0 %1803 }
 0x15f   : > { %3418 = vmatpush3.bf16.msra.mxu1 %v3566_v63  ;;  %1820 = vst.msk [vmem:[#allocation3 + $0xb0] sm:$0xff] %vm1139_vm15, %v1804_v5 }
 0x161   : > { %v1130_v6 = vpop.permute.xlu1 %1129 }
 0x162   : > { %1147 = vst.msk [vmem:[#allocation3 + $0xa8] sm:$0xff] %vm1139_vm15, %v1130_v6  ;;  %v1896_v7 = vpop.permute.xlu0 %1895  ;;  %v2333_v8 = vld [vmem:[#allocation3 + $0x20] sm:$0xff] }
 0x163   : > { %1912 = vst.msk [vmem:[#allocation3 + $0xb0] sm:$0xff] %vm1303_vm0, %v1896_v7  ;;  %2568 = vmatprep.mubr.bf16.mxu0 %v2333_v8 }
 0x165   : > { %v1294_v9 = vpop.permute.xlu1 %1293  ;;  %v2332_v11 = vld [vmem:[#allocation3 + $0x18] sm:$0xff] }
 0x166   : > { %1311 = vst.msk [vmem:[#allocation3 + $0xa8] sm:$0xff] %vm1303_vm0, %v1294_v9  ;;  %2569 = vmatmul.mubr.bf16.gmra.mrb[4].mxu0 %v2332_v11  ;;  %v2168_v12 = vpop.permute.xlu0 %2167 }
 0x167   : > { %2184 = vst.msk [vmem:[#allocation3 + $0xb0] sm:$0xff] %vm1396_vm1, %v2168_v12 }
 0x169   : > { %v1387_v13 = vpop.permute.xlu1 %1386 }
 0x16a   : > { %1404 = vst.msk [vmem:[#allocation3 + $0xa8] sm:$0xff] %vm1396_vm1, %v1387_v13  ;;  %v1794_v15 = vpop.permute.xlu0 %1793 }
 0x16b   : > { %1815 = vst.msk [vmem:[#allocation3 + $0x38] sm:$0xff] %vm1139_vm15, %v1794_v15 }
 0x16d   : > { %v1120_v16 = vpop.permute.xlu1 %1119 }
 0x16e   : > { %1142 = vst.msk [vmem:[#allocation3 + $0x30] sm:$0xff] %vm1139_vm15, %v1120_v16  ;;  %v1886_v18 = vpop.permute.xlu0 %1885  ;;  %v2351_v19 = vld [vmem:[#allocation3 + $0xb0] sm:$0xff] }
 0x16f   : > { %1907 = vst.msk [vmem:[#allocation3 + $0x38] sm:$0xff] %vm1303_vm0, %v1886_v18  ;;  %2616 = vmatprep.mubr.bf16.mxu1 %v2351_v19  ;;  %v4649_v18 = vld [vmem:[#allocation6] ss:$0 sm:$0xff] }
 0x171   : > { %v1284_v21 = vpop.permute.xlu1 %1283  ;;  %v2350_v22 = vld [vmem:[#allocation3 + $0xa8] sm:$0xff] }
 0x172   : > { %1306 = vst.msk [vmem:[#allocation3 + $0x30] sm:$0xff] %vm1303_vm0, %v1284_v21  ;;  %2617 = vmatmul.mubr.bf16.gmra.mrb[4].mxu1 %v2350_v22  ;;  %v2158_v23 = vpop.permute.xlu0 %2157  ;;  %v4652_v21 = vld [vmem:[#allocation8] ss:$0 sm:$0xff] }
 0x173   : > { %3419 = vmatprep.mubr.msk.bf16.mxu1 %vm863_vm14, %v2331_v20  ;;  %2179 = vst.msk [vmem:[#allocation3 + $0x38] sm:$0xff] %vm1396_vm1, %v2158_v23 }
 0x175   : > { %v1377_v25 = vpop.permute.xlu1 %1376 }
 0x176   : > { %1399 = vst.msk [vmem:[#allocation3 + $0x30] sm:$0xff] %vm1396_vm1, %v1377_v25  ;;  %v1796_v26 = vpop.permute.xlu0 %1795 }
 0x177   : > { %1816 = vst.msk [vmem:[#allocation3 + $0x50] sm:$0xff] %vm1139_vm15, %v1796_v26 }
 0x179   : > { %v1122_v29 = vpop.permute.xlu1 %1121 }
 0x17a   : > { %1143 = vst.msk [vmem:[#allocation3 + $0x48] sm:$0xff] %vm1139_vm15, %v1122_v29  ;;  %3420 = vmatmul.mubr.msk.bf16.vlgmr.msra.gmra.mrb[8].mxu1 %vm863_vm14, %v2334_v27  ;;  %v1888_v30 = vpop.permute.xlu0 %1887  ;;  %v2336_v31 = vld [vmem:[#allocation3 + $0x38] sm:$0xff] }
 0x17b   : > { %3423 = vmatprep.mubr.msk.bf16.mxu1 %vm863_vm14, %v2337_v28  ;;  %1908 = vst.msk [vmem:[#allocation3 + $0x50] sm:$0xff] %vm1303_vm0, %v1888_v30  ;;  %2576 = vmatprep.mubr.bf16.mxu0 %v2336_v31 }
 0x17d   : > { %v1286_v32 = vpop.permute.xlu1 %1285  ;;  %v2335_v17 = vld [vmem:[#allocation3 + $0x30] sm:$0xff] }
 0x17e   : > { %1307 = vst.msk [vmem:[#allocation3 + $0x48] sm:$0xff] %vm1303_vm0, %v1286_v32  ;;  %2577 = vmatmul.mubr.bf16.gmra.mrb[8].mxu0 %v2335_v17  ;;  %v2160_v24 = vpop.permute.xlu0 %2159 }
 0x17f   : > { %2180 = vst.msk [vmem:[#allocation3 + $0x50] sm:$0xff] %vm1396_vm1, %v2160_v24 }
 0x181   : > { %v1379_v35 = vpop.permute.xlu1 %1378 }
 0x182   : > { %1400 = vst.msk [vmem:[#allocation3 + $0x48] sm:$0xff] %vm1396_vm1, %v1379_v35  ;;  %3424 = vmatmul.mubr.msk.bf16.gmra.mrb[12].mxu1 %vm863_vm14, %v2340_v33  ;;  %v1798_v36 = vpop.permute.xlu0 %1797 }
 0x183   : > { %3427 = vmatprep.mubr.msk.bf16.mxu1 %vm863_vm14, %v2343_v34  ;;  %1817 = vst.msk [vmem:[#allocation3 + $0x68] sm:$0xff] %vm1139_vm15, %v1798_v36 }
 0x185   : > { %v1124_v37 = vpop.permute.xlu1 %1123 }
 0x186   : > { %1144 = vst.msk [vmem:[#allocation3 + $0x60] sm:$0xff] %vm1139_vm15, %v1124_v37  ;;  %v1890_v38 = vpop.permute.xlu0 %1889  ;;  %v2339_v39 = vld [vmem:[#allocation3 + $0x50] sm:$0xff] }
 0x187   : > { %1909 = vst.msk [vmem:[#allocation3 + $0x68] sm:$0xff] %vm1303_vm0, %v1890_v38  ;;  %2584 = vmatprep.mubr.bf16.mxu0 %v2339_v39 }
 0x189   : > { %v1288_v42 = vpop.permute.xlu1 %1287  ;;  %v2338_v43 = vld [vmem:[#allocation3 + $0x48] sm:$0xff] }
 0x18a   : > { %1308 = vst.msk [vmem:[#allocation3 + $0x60] sm:$0xff] %vm1303_vm0, %v1288_v42  ;;  %2585 = vmatmul.mubr.bf16.gmra.mrb[12].mxu0 %v2338_v43  ;;  %3428 = vmatmul.mubr.msk.bf16.gmra.mrb[16].mxu1 %vm863_vm14, %v2346_v40  ;;  %v2162_v44 = vpop.permute.xlu0 %2161 }
 0x18b   : > { %3431 = vmatprep.mubr.msk.bf16.mxu1 %vm863_vm14, %v2349_v41  ;;  %2181 = vst.msk [vmem:[#allocation3 + $0x68] sm:$0xff] %vm1396_vm1, %v2162_v44 }
 0x18d   : > { %v1381_v45 = vpop.permute.xlu1 %1380 }
 0x18e   : > { %1401 = vst.msk [vmem:[#allocation3 + $0x60] sm:$0xff] %vm1396_vm1, %v1381_v45  ;;  %v1800_v46 = vpop.permute.xlu0 %1799 }
 0x18f   : > { %1818 = vst.msk [vmem:[#allocation3 + $0x80] sm:$0xff] %vm1139_vm15, %v1800_v46 }
 0x191   : > { %v1126_v48 = vpop.permute.xlu1 %1125 }
 0x192   : > { %1145 = vst.msk [vmem:[#allocation3 + $0x78] sm:$0xff] %vm1139_vm15, %v1126_v48  ;;  %3432 = vmatmul.mubr.msk.bf16.gmra.mrb[20].mxu1 %vm863_vm14, %v2352_v47  ;;  %v1892_v49 = vpop.permute.xlu0 %1891  ;;  %v2342_v50 = vld [vmem:[#allocation3 + $0x68] sm:$0xff] }
 0x193   : > { %1910 = vst.msk [vmem:[#allocation3 + $0x80] sm:$0xff] %vm1303_vm0, %v1892_v49  ;;  %2592 = vmatprep.mubr.bf16.mxu0 %v2342_v50 }
 0x195   : > { %v1290_v51 = vpop.permute.xlu1 %1289  ;;  %v2341_v52 = vld [vmem:[#allocation3 + $0x60] sm:$0xff] }
 0x196   : > { %1309 = vst.msk [vmem:[#allocation3 + $0x78] sm:$0xff] %vm1303_vm0, %v1290_v51  ;;  %2593 = vmatmul.mubr.bf16.gmra.mrb[16].mxu0 %v2341_v52  ;;  %v2164_v53 = vpop.permute.xlu0 %2163 }
 0x197   : > { %2182 = vst.msk [vmem:[#allocation3 + $0x80] sm:$0xff] %vm1396_vm1, %v2164_v53 }
 0x199   : > { %v1383_v54 = vpop.permute.xlu1 %1382 }
 0x19a   : > { %1402 = vst.msk [vmem:[#allocation3 + $0x78] sm:$0xff] %vm1396_vm1, %v1383_v54 }
 0x19e   : > { %v2345_v55 = vld [vmem:[#allocation3 + $0x80] sm:$0xff] }
 0x19f   : > { %2600 = vmatprep.mubr.bf16.mxu0 %v2345_v55 }
 0x1a1   : > { %v2344_v56 = vld [vmem:[#allocation3 + $0x78] sm:$0xff] }
 0x1a2   : > { %2601 = vmatmul.mubr.bf16.gmra.mrb[20].mxu0 %v2344_v56 }
 0x221   : > { %v3357_v57 = vpop.f32.mrb[0].mxu0 }
 0x222   : > { %v3358_v58 = vpop.f32.mrb[1].mxu0 }
 0x223   : > { %v3359_v59 = vadd.f32 %v3358_v58, %v3357_v57  ;;  %v3360_v60 = vpop.f32.mrb[2].mxu0 }
 0x224   : > { %v3361_v61 = vpop.f32.mrb[3].mxu0 }
 0x225   : > { %v3362_v62 = vadd.f32 %v3361_v61, %v3360_v60  ;;  %v2563_v22 = vadd.f32 %v3359_v59, %v4649_v18 }
 0x227   : > { %v2566_v29 = vadd.f32 %v3362_v62, %v4649_v18 }
 0x22d   : > { %v3393_v63 = vpop.f32.mrb[0].mxu1 }
 0x22e   : > { %v3394_v0 = vpop.f32.mrb[1].mxu1 }
 0x22f   : > { %v4641_v1 = vadd.f32 %v3394_v0, %v3393_v63  ;;  %v3396_v2 = vpop.f32.mrb[2].mxu1 }
 0x230   : > { %v3397_v3 = vpop.f32.mrb[3].mxu1 }
 0x231   : > { %v4643_v14 = vadd.f32 %v3397_v3, %v3396_v2 }
 0x239   : > { %v3363_v10 = vpop.f32.mrb[4].mxu0 }
 0x23a   : > { %v3364_v4 = vpop.f32.mrb[5].mxu0 }
 0x23b   : > { %v3365_v5 = vadd.f32 %v3364_v4, %v3363_v10  ;;  %v3366_v6 = vpop.f32.mrb[6].mxu0 }
 0x23c   : > { %v3367_v7 = vpop.f32.mrb[7].mxu0 }
 0x23d   : > { %v3368_v8 = vadd.f32 %v3367_v7, %v3366_v6  ;;  %v2571_v19 = vadd.f32 %v3365_v5, %v4649_v18 }
 0x23f   : > { %v2574_v26 = vadd.f32 %v3368_v8, %v4649_v18 }
 0x245   : > { %v3399_v9 = vpop.f32.mrb[4].mxu1 }
 0x246   : > { %v3400_v11 = vpop.f32.mrb[5].mxu1 }
 0x247   : > { %v4645_v12 = vadd.f32 %v3400_v11, %v3399_v9  ;;  %v3402_v13 = vpop.f32.mrb[6].mxu1 }
 0x248   : > { %v3403_v15 = vpop.f32.mrb[7].mxu1 }
 0x249   : > { %v4647_v16 = vadd.f32 %v3403_v15, %v3402_v13  ;;  %v2619_v9 = vadd.f32 %v4645_v12, %v4649_v18  ;;  %v2614_v12 = vadd.f32 %v4643_v14, %v4649_v18 }
 0x24d   : > { %v3421_v20 = vpop.f32.mrb[8].mxu1 }
 0x24e   : > { %v2668_v23 = vadd.f32 %v3421_v20, %v2571_v19  ;;  %v2659_v25 = vpop.f32.mrb[9].mxu1  ;;  %v2611_v19 = vadd.f32 %v4641_v1, %v4649_v18 }
 0x24f   : > { %v2660_v27 = vadd.f32 %v2659_v25, %v2563_v22  ;;  %v3422_v28 = vpop.f32.mrb[10].mxu1 }
 0x250   : > { %v2747_v30 = vmul.f32 %v4652_v21, %v2668_v23  ;;  %v2671_v31 = vadd.f32 %v3422_v28, %v2574_v26  ;;  %v2662_v32 = vpop.f32.mrb[11].mxu1  ;;  %vm2724_vm2 = vcmp.ge.f32.partialorder %v2668_v23, 0.0 }
 0x251   : > { %vm2722_vm3 = vcmp.ge.f32.partialorder %v2660_v27, 0.0  ;;  %v2745_v17 = vmul.f32 %v4652_v21, %v2660_v27  ;;  %v2663_v24 = vadd.f32 %v2662_v32, %v2566_v29  ;;  %v3369_v33 = vpop.f32.mrb[8].mxu0 }
 0x252   : > { %vm2725_vm4 = vcmp.ge.f32.partialorder %v2671_v31, 0.0  ;;  %v2748_v34 = vmul.f32 %v4652_v21, %v2671_v31  ;;  %v3370_v35 = vpop.f32.mrb[9].mxu0  ;;  %v2763_v39 = vsel %vm2724_vm2, %v2668_v23, %v2747_v30  ;;  %v2622_v23 = vadd.f32 %v4647_v16, %v4649_v18 }
 0x253   : > { %vm2723_vm5 = vcmp.ge.f32.partialorder %v2663_v24, 0.0  ;;  %v2746_v36 = vmul.f32 %v4652_v21, %v2663_v24  ;;  %v3371_v37 = vadd.f32 %v3370_v35, %v3369_v33  ;;  %v3372_v38 = vpop.f32.mrb[10].mxu0  ;;  %v2761_v40 = vsel %vm2722_vm3, %v2660_v27, %v2745_v17 }
 0x254   : > { %v2764_v41 = vsel %vm2725_vm4, %v2671_v31, %v2748_v34  ;;  %v3373_v42 = vpop.f32.mrb[11].mxu0 }
 0x255   : > { %v3302_v43 = vpack.c.bf16 %v2764_v41, %v2763_v39  ;;  %v2762_v44 = vsel %vm2723_vm5, %v2663_v24, %v2746_v36  ;;  %v3374_v45 = vadd.f32 %v3373_v42, %v3372_v38  ;;  %v3425_v46 = vpop.f32.mrb[12].mxu1  ;;  %v2579_v47 = vadd.f32 %v3371_v37, %v4649_v18 }
 0x256   : > { %v3297_v48 = vpack.c.bf16 %v2762_v44, %v2761_v40  ;;  %v2675_v49 = vpop.f32.mrb[13].mxu1 }
 0x257   : > { %3334 = vst [vmem:[%s3877_s30 + $0x8] sm:$0xff] %v3302_v43   ;;  %v2676_v50 = vadd.f32 %v2675_v49, %v2579_v47  ;;  %v3426_v51 = vpop.f32.mrb[14].mxu1  ;;  %v2582_v52 = vadd.f32 %v3374_v45, %v4649_v18 }
 0x258   : > { %3298 = vst [vmem:[%s3877_s30] sm:$0xff] %v3297_v48   ;;  %v2678_v53 = vpop.f32.mrb[15].mxu1 }
 0x259   : > { %v2749_v54 = vmul.f32 %v4652_v21, %v2676_v50  ;;  %v2679_v55 = vadd.f32 %v2678_v53, %v2582_v52  ;;  %vm2726_vm6 = vcmp.ge.f32.partialorder %v2676_v50, 0.0 }
 0x25b   : > { %vm2727_vm7 = vcmp.ge.f32.partialorder %v2679_v55, 0.0  ;;  %v2750_v56 = vmul.f32 %v4652_v21, %v2679_v55  ;;  %v2765_v57 = vsel %vm2726_vm6, %v2676_v50, %v2749_v54 }
 0x25d   : > { %v2766_v58 = vsel %vm2727_vm7, %v2679_v55, %v2750_v56  ;;  %v3375_v59 = vpop.f32.mrb[12].mxu0  ;;  %v4667_v60 = vpop.f32.mrb[16].mxu1 }
 0x25e   : > { %v3307_v61 = vpack.c.bf16 %v2766_v58, %v2765_v57  ;;  %v3376_v62 = vpop.f32.mrb[13].mxu0  ;;  %v2691_v63 = vpop.f32.mrb[17].mxu1 }
 0x25f   : > { %v3377_v0 = vadd.f32 %v3376_v62, %v3375_v59  ;;  %v3378_v2 = vpop.f32.mrb[14].mxu0  ;;  %v4669_v3 = vpop.f32.mrb[18].mxu1 }
 0x260   : > { %3335 = vst [vmem:[%s3877_s30 + $0x10] sm:$0xff] %v3307_v61   ;;  %v3379_v10 = vpop.f32.mrb[15].mxu0  ;;  %v2694_v4 = vpop.f32.mrb[19].mxu1 }
 0x261   : > { %v2587_v5 = vadd.f32 %v3377_v0, %v4649_v18  ;;  %v3380_v6 = vadd.f32 %v3379_v10, %v3378_v2 }
 0x263   : > { %v2684_v7 = vadd.f32 %v3425_v46, %v2587_v5  ;;  %v2590_v8 = vadd.f32 %v3380_v6, %v4649_v18 }
 0x265   : > { %vm2728_vm8 = vcmp.ge.f32.partialorder %v2684_v7, 0.0  ;;  %v2751_v11 = vmul.f32 %v4652_v21, %v2684_v7  ;;  %v2687_v13 = vadd.f32 %v3426_v51, %v2590_v8  ;;  %v3433_v15 = vpop.f32.mrb[20].mxu1 }
 0x266   : > { %v2716_v20 = vadd.f32 %v3433_v15, %v2619_v9  ;;  %v2707_v22 = vpop.f32.mrb[21].mxu1 }
 0x267   : > { %vm2729_vm9 = vcmp.ge.f32.partialorder %v2687_v13, 0.0  ;;  %v2752_v25 = vmul.f32 %v4652_v21, %v2687_v13  ;;  %v2708_v26 = vadd.f32 %v2707_v22, %v2611_v19  ;;  %v3434_v27 = vpop.f32.mrb[22].mxu1  ;;  %v2767_v28 = vsel %vm2728_vm8, %v2684_v7, %v2751_v11 }
 0x268   : > { %vm2736_vm10 = vcmp.ge.f32.partialorder %v2716_v20, 0.0  ;;  %v2759_v29 = vmul.f32 %v4652_v21, %v2716_v20  ;;  %v2719_v30 = vadd.f32 %v3434_v27, %v2622_v23  ;;  %v2710_v1 = vpop.f32.mrb[23].mxu1 }
 0x269   : > { %v2768_v31 = vsel %vm2729_vm9, %v2687_v13, %v2752_v25  ;;  %vm2734_vm11 = vcmp.ge.f32.partialorder %v2708_v26, 0.0  ;;  %v2757_v32 = vmul.f32 %v4652_v21, %v2708_v26  ;;  %v2711_v16 = vadd.f32 %v2710_v1, %v2614_v12  ;;  %v3381_v17 = vpop.f32.mrb[16].mxu0 }
 0x26a   : > { %v3312_v24 = vpack.c.bf16 %v2768_v31, %v2767_v28  ;;  %vm2737_vm12 = vcmp.ge.f32.partialorder %v2719_v30, 0.0  ;;  %v2760_v33 = vmul.f32 %v4652_v21, %v2719_v30  ;;  %v3382_v34 = vpop.f32.mrb[17].mxu0  ;;  %v2775_v37 = vsel %vm2736_vm10, %v2716_v20, %v2759_v29 }
 0x26b   : > { %vm2735_vm13 = vcmp.ge.f32.partialorder %v2711_v16, 0.0  ;;  %v2758_v14 = vmul.f32 %v4652_v21, %v2711_v16  ;;  %v3383_v35 = vadd.f32 %v3382_v34, %v3381_v17  ;;  %v3384_v36 = vpop.f32.mrb[18].mxu0  ;;  %v2773_v38 = vsel %vm2734_vm11, %v2708_v26, %v2757_v32 }
 0x26c   : > { %3336 = vst [vmem:[%s3877_s30 + $0x18] sm:$0xff] %v3312_v24   ;;  %v2776_v39 = vsel %vm2737_vm12, %v2719_v30, %v2760_v33  ;;  %v3385_v40 = vpop.f32.mrb[19].mxu0 }
 0x26d   : > { %v3332_v41 = vpack.c.bf16 %v2776_v39, %v2775_v37  ;;  %v2774_v42 = vsel %vm2735_vm13, %v2711_v16, %v2758_v14  ;;  %v2595_v43 = vadd.f32 %v3383_v35, %v4649_v18  ;;  %v3386_v44 = vadd.f32 %v3385_v40, %v3384_v36 }
 0x26e   : > { %v3327_v45 = vpack.c.bf16 %v2774_v42, %v2773_v38 }
 0x26f   : > { %3340 = vst [vmem:[%s3877_s30 + $0x38] sm:$0xff] %v3332_v41   ;;  %v2692_v46 = vadd.f32 %v2691_v63, %v2595_v43  ;;  %v2598_v47 = vadd.f32 %v3386_v44, %v4649_v18 }
 0x270   : > { %3339 = vst [vmem:[%s3877_s30 + $0x30] sm:$0xff] %v3327_v45  }
 0x271   : > { %v2753_v48 = vmul.f32 %v4652_v21, %v2692_v46  ;;  %v2695_v49 = vadd.f32 %v2694_v4, %v2598_v47  ;;  %vm2730_vm14 = vcmp.ge.f32.partialorder %v2692_v46, 0.0 }
 0x273   : > { %vm2731_vm15 = vcmp.ge.f32.partialorder %v2695_v49, 0.0  ;;  %v2754_v50 = vmul.f32 %v4652_v21, %v2695_v49  ;;  %v2769_v51 = vsel %vm2730_vm14, %v2692_v46, %v2753_v48 }
 0x275   : > { %v2770_v52 = vsel %vm2731_vm15, %v2695_v49, %v2754_v50  ;;  %v3387_v53 = vpop.f32.mrb[20].mxu0 }
 0x276   : > { %v3317_v54 = vpack.c.bf16 %v2770_v52, %v2769_v51  ;;  %v3388_v55 = vpop.f32.mrb[21].mxu0 }
 0x277   : > { %v3389_v56 = vadd.f32 %v3388_v55, %v3387_v53  ;;  %v3390_v57 = vpop.f32.mrb[22].mxu0 }
 0x278   : > { %3337 = vst [vmem:[%s3877_s30 + $0x20] sm:$0xff] %v3317_v54   ;;  %v3391_v58 = vpop.f32.mrb[23].mxu0 }
 0x279   : > { %v2603_v59 = vadd.f32 %v3389_v56, %v4649_v18  ;;  %v3392_v61 = vadd.f32 %v3391_v58, %v3390_v57 }
 0x27b   : > { %v2700_v62 = vadd.f32 %v4667_v60, %v2603_v59  ;;  %v2606_v63 = vadd.f32 %v3392_v61, %v4649_v18 }
 0x27d   : > { %v2755_v0 = vmul.f32 %v4652_v21, %v2700_v62  ;;  %v2703_v2 = vadd.f32 %v4669_v3, %v2606_v63  ;;  %vm2732_vm0 = vcmp.ge.f32.partialorder %v2700_v62, 0.0 }
 0x27f   : > { %vm2733_vm1 = vcmp.ge.f32.partialorder %v2703_v2, 0.0  ;;  %v2756_v10 = vmul.f32 %v4652_v21, %v2703_v2  ;;  %v2771_v4 = vsel %vm2732_vm0, %v2700_v62, %v2755_v0 }
 0x281   : > { %v2772_v5 = vsel %vm2733_vm1, %v2703_v2, %v2756_v10 }
 0x282   : > { %v3322_v6 = vpack.c.bf16 %v2772_v5, %v2771_v4 }
 0x284   : > { %3338 = vst [vmem:[%s3877_s30 + $0x28] sm:$0xff] %v3322_v6  }
 0x285 PF: > { %s16_s19 = sadd.s32 1, %s3701_s19   ;;  %s4746_s15 = smov %s3693_s17 }
 0x286   : > { %p13_p10 = scmp.ge.s32.totalorder %s16_s19, 6   ;;  %s4747_s16 = smov %s3697_s18 }
 0x287   : > { %s4748_s17 = smov %s4751_s26  ;;  %s4749_s18 = smov %s4755_s14 }
 0x288   :  { %15 = sbr.rel (!%p13_p10) target bundleno = 4 (0x4), region = 87 }
 0x28f   :  { %2887 = vsyncpa [#allocation5], 1 }
 0x290   :  { %2889 = vsyncpa [#allocation5 + $0x1], 1 }
 0x291   :  { %2890 = vsyncpa [#allocation7], 1 }

</bundles_post_ra>
